<compile_context>
chip_gen: v6e
topology: v6e:2x2x1
jax: 0.10.0
libtpu: 0.0.40
codegen_flags: <defaults>
</compile_context>

<pallas_src>
import functools

import jax
import jax.numpy as jnp
import numpy as np
from jax import lax
from jax.experimental import pallas as pl
from jax.experimental.pallas import tpu as pltpu


# ----------------------------- kernel helpers ------------------------------ #

def _tanh(x, act_dtype):
    """tanh, optionally run in bf16 (v6e/v7x EUP) with an f32 result."""
    if np.dtype(act_dtype) == np.dtype(np.float32):
        return jnp.tanh(x)
    return jnp.tanh(x.astype(act_dtype)).astype(jnp.float32)


def _cell_step(h, c, proj, whh, hdim, matmul_dtype, act_dtype):
    """One LSTM cell step with the input projection already precomputed.

    proj: (Bt, 4*hdim)  x(t)@Wih + (b_ih+b_hh), gates packed [i, f, o, g] with
          the 0.5 tanh-identity pre-scale folded into the i/f/o blocks.
    whh : (hdim, 4*hdim) recurrent weights, packed the same way.
    """
    gates = jnp.dot(h.astype(matmul_dtype), whh,
                    preferred_element_type=jnp.float32) + proj
    tg = _tanh(gates, act_dtype)              # ONE EUP pass over all 4 gates
    i_g = 0.5 * tg[:, :hdim] + 0.5            # sigmoid(z) = 0.5*tanh(z/2)+0.5
    f_g = 0.5 * tg[:, hdim:2 * hdim] + 0.5
    o_g = 0.5 * tg[:, 2 * hdim:3 * hdim] + 0.5
    g_g = tg[:, 3 * hdim:]
    c_new = f_g * c + i_g * g_g
    h_new = o_g * _tanh(c_new, act_dtype)
    return h_new, c_new


def _foreach(steps, body, carry, unrolled):
    if unrolled:
        for t in range(steps):
            carry = body(t, carry)
        return carry
    return lax.fori_loop(0, steps, body, carry)   # serial dep: no unroll


# ----------------------------- kernel -------------------------------------- #

def lstm_encoder_kernel(x_ref, wih1_ref, whh1_ref, b1_ref,
                        wih2_ref, whh2_ref, b2_ref, out_ref,
                        xw1_scr, h0_scr, hw2_scr,
                        *, steps, hidden_dim, emb_dim, emb_pad,
                        matmul_dtype, act_dtype):
    Bt = x_ref.shape[1]
    H, E, Ep = hidden_dim, emb_dim, emb_pad
    unrolled = steps <= 16

    # Hoisted weight/bias loads (outside every loop).
    wih1 = wih1_ref[...].astype(matmul_dtype)            # (I,  4H)
    whh1 = whh1_ref[...].astype(matmul_dtype)            # (H,  4H)
    whh2 = whh2_ref[...].astype(matmul_dtype)            # (Ep, 4Ep)
    b1 = b1_ref[...]                                     # (1, 4H)  f32

    def _off(t):
        return t * Bt if unrolled else pl.multiple_of(t * Bt, Bt)

    # ---- phase 1: input projection for all steps (off the critical path) ---
    # Per-step M = Bt already fills the MXU M dimension at production batch
    # tiles; bias b1 is folded in here, never inside the recurrence.
    def proj1(t, carry):
        xw1_scr[pl.ds(_off(t), Bt), :] = (
            jnp.dot(x_ref[t].astype(matmul_dtype), wih1,
                    preferred_element_type=jnp.float32) + b1)
        return carry

    _foreach(steps, proj1, 0, unrolled)

    # ---- phase 2: cell-1 recurrence — only (Bt,H)@(H,4H) per step ----------
    def cell1_step(t, carry):
        h0, c0 = carry
        h0, c0 = _cell_step(h0, c0, xw1_scr[pl.ds(_off(t), Bt), :],
                            whh1, H, matmul_dtype, act_dtype)
        h0_scr[pl.ds(_off(t), Bt), :] = h0
        return h0, c0

    z1 = jnp.zeros((Bt, H), jnp.float32)
    _foreach(steps, cell1_step, (z1, z1), unrolled)

    # ---- phase 3: cross-layer projection for ALL steps: one batched matmul -
    hw2_scr[...] = (
        jnp.dot(h0_scr[...].astype(matmul_dtype),
                wih2_ref[...].astype(matmul_dtype),
                preferred_element_type=jnp.float32) + b2_ref[...])

    # ---- phase 4: cell-2 recurrence — tiny K=Ep dot per step ---------------
    def cell2_step(t, carry):
        h1, c1 = carry
        return _cell_step(h1, c1, hw2_scr[pl.ds(_off(t), Bt), :],
                          whh2, Ep, matmul_dtype, act_dtype)

    z2 = jnp.zeros((Bt, Ep), jnp.float32)
    h1, _ = _foreach(steps, cell2_step, (z2, z2), unrolled)

    out_ref[...] = h1[:, :E].astype(out_ref.dtype)


# ----------------------------- packing helpers ----------------------------- #

def _pack_gates(a, e, ep):
    """PyTorch gate order (i,f,g,o) stacked on the leading axis (width e each)
    -> packed (i,f,o,g), each gate zero-padded to width ep, with the 0.5
    tanh-identity pre-scale folded into the i/f/o blocks."""
    i, f, g, o = a[:e], a[e:2 * e], a[2 * e:3 * e], a[3 * e:4 * e]
    pad = [(0, ep - e)] + [(0, 0)] * (a.ndim - 1)
    p = lambda x: jnp.pad(x, pad)
    return jnp.concatenate([p(0.5 * i), p(0.5 * f), p(0.5 * o), p(g)], axis=0)


def _pack_cell(params, e, ep, matmul_dtype):
    """nn.LSTMCell params -> (in,4ep) Wih^T, (ep,4ep) Whh^T, (1,4ep) fused bias."""
    wih = _pack_gates(params["weight_ih"], e, ep)                # (4ep, in)
    whh = _pack_gates(params["weight_hh"], e, ep)                # (4ep, e)
    whh = jnp.pad(whh, ((0, 0), (0, ep - e)))                    # zero rows for padded h lanes
    b = _pack_gates(params["bias_ih"] + params["bias_hh"], e, ep)  # (4ep,)
    return (wih.T.astype(matmul_dtype),
            whh.T.astype(matmul_dtype),
            b[None, :].astype(jnp.float32))


# ----------------------------- device heuristics --------------------------- #

def _device_kind():
    try:
        return jax.devices()[0].device_kind.lower()
    except Exception:
        return ""


def _default_act_dtype(kind):
    # bf16 VPU/EUP only on v6e and later; keep f32 activations on v5e/older.
    if any(v in kind for v in ("v2", "v3", "v4", "v5")):
        return jnp.float32
    return jnp.bfloat16


def _pick_batch_tile(B, kind):
    two_tc = "v7" in kind                       # v7x: 2 TensorCores / chip
    max_tile = 128 if "v5" in kind else 256     # v5e MXU is 128x128
    candidates = [t for t in (256, 128, 64, 32, 16, 8) if t <= max_tile]
    for t in candidates:                        # prefer >= 2 grid tiles on v7x
        if B % t == 0 and B // t >= (2 if two_tc else 1):
            return t
    for t in candidates:
        if B % t == 0:
            return t
    return B                                    # last resort: one full tile


# ----------------------------- wrapper -------------------------------------- #

def lstm_encoder_forward(time_series, params, steps, *,
                         matmul_dtype=jnp.bfloat16, act_dtype=None,
                         batch_tile=None):
    """time_series: (B, T, I) f32, like the PyTorch module. Returns (B, E) f32."""
    B, T, I = time_series.shape
    H = params["cell1"]["weight_hh"].shape[1]
    E = params["cell2"]["weight_hh"].shape[1]
    assert T >= steps

    kind = _device_kind()
    if act_dtype is None:
        act_dtype = _default_act_dtype(kind)
    if batch_tile is None:
        batch_tile = _pick_batch_tile(B, kind)
    assert B % batch_tile == 0
    num_tiles = B // batch_tile

    # Pad cell-2's per-gate width so 4*Ep is a multiple of 128 lanes (24 -> 32).
    Ep = max(32, ((E + 31) // 32) * 32)

    # Only the first `steps` slices are consumed -> don't DMA the rest.
    # Time-major so each step is a leading-axis index inside the kernel.
    x_tm = jnp.transpose(time_series[:, :steps, :], (1, 0, 2)).astype(jnp.float32)

    wih1, whh1, b1 = _pack_cell(params["cell1"], H, H, matmul_dtype)
    wih2, whh2, b2 = _pack_cell(params["cell2"], E, Ep, matmul_dtype)

    kernel = functools.partial(
        lstm_encoder_kernel, steps=steps, hidden_dim=H, emb_dim=E, emb_pad=Ep,
        matmul_dtype=matmul_dtype, act_dtype=act_dtype)

    flops = 2 * steps * B * (I * 4 * H + H * 4 * H + H * 4 * Ep + Ep * 4 * Ep)
    transcendentals = steps * B * 5 * (H + Ep)
    bytes_accessed = int(
        x_tm.size * 4
        + sum(int(w.size) * w.dtype.itemsize for w in (wih1, whh1, wih2, whh2))
        + (int(b1.size) + int(b2.size)) * 4 + B * E * 4)

    # VMEM scratch at steps=5, batch_tile=256, H=256 is ~7 MiB — comfortably
    # inside the default scoped VMEM limit on v5e/v6e/v7x.  For much longer
    # sequences the time axis of these scratches would need chunking
    # (tightest on v7x's 64 MiB physical VMEM).
    grid_spec = pltpu.PrefetchScalarGridSpec(
        num_scalar_prefetch=0,
        grid=(num_tiles,),
        in_specs=[
            pl.BlockSpec((steps, batch_tile, I), lambda b: (0, b, 0)),
            pl.BlockSpec((I, 4 * H), lambda b: (0, 0)),
            pl.BlockSpec((H, 4 * H), lambda b: (0, 0)),
            pl.BlockSpec((1, 4 * H), lambda b: (0, 0)),
            pl.BlockSpec((H, 4 * Ep), lambda b: (0, 0)),
            pl.BlockSpec((Ep, 4 * Ep), lambda b: (0, 0)),
            pl.BlockSpec((1, 4 * Ep), lambda b: (0, 0)),
        ],
        out_specs=pl.BlockSpec((batch_tile, E), lambda b: (b, 0)),
        scratch_shapes=[
            pltpu.VMEM((steps * batch_tile, 4 * H), jnp.float32),   # xW1 + b1
            pltpu.VMEM((steps * batch_tile, H), jnp.float32),       # h0 history
            pltpu.VMEM((steps * batch_tile, 4 * Ep), jnp.float32),  # h0W2 + b2
        ],
    )

    return pl.pallas_call(
        kernel,
        out_shape=jax.ShapeDtypeStruct((B, E), jnp.float32),
        grid_spec=grid_spec,
        compiler_params=pltpu.CompilerParams(
            dimension_semantics=("parallel",)),
        cost_estimate=pl.CostEstimate(
            flops=int(flops),
            transcendentals=int(transcendentals),
            bytes_accessed=int(bytes_accessed)),
    )(x_tm, wih1, whh1, b1, wih2, whh2, b2)


# ----------------------------- reference ----------------------------------- #

def lstm_encoder_ref(time_series, params, steps):
    """Pure-JAX reference mirroring the PyTorch forward (nn.LSTMCell layout)."""
    B = time_series.shape[0]
    H = params["cell1"]["weight_hh"].shape[1]
    E = params["cell2"]["weight_hh"].shape[1]

    def cell(x, h, c, p):
        gates = (x @ p["weight_ih"].T + h @ p["weight_hh"].T
                 + p["bias_ih"] + p["bias_hh"])
        i, f, g, o = jnp.split(gates, 4, axis=-1)
        c_new = jax.nn.sigmoid(f) * c + jax.nn.sigmoid(i) * jnp.tanh(g)
        return jax.nn.sigmoid(o) * jnp.tanh(c_new), c_new

    h0 = jnp.zeros((B, H), jnp.float32)
    c0 = jnp.zeros((B, H), jnp.float32)
    h1 = jnp.zeros((B, E), jnp.float32)
    c1 = jnp.zeros((B, E), jnp.float32)
    for t in range(steps):
        h0, c0 = cell(time_series[:, t, :], h0, c0, params["cell1"])
        h1, c1 = cell(h0, h1, c1, params["cell2"])
    return h1


def init_lstmcell_params(key, in_dim, hid_dim):
    """nn.LSTMCell-style init: uniform(-1/sqrt(H), 1/sqrt(H)), PyTorch layout."""
    lim = 1.0 / np.sqrt(hid_dim)
    ks = jax.random.split(key, 4)
    u = lambda k, shape: jax.random.uniform(k, shape, jnp.float32, -lim, lim)
    return {
        "weight_ih": u(ks[0], (4 * hid_dim, in_dim)),
        "weight_hh": u(ks[1], (4 * hid_dim, hid_dim)),
        "bias_ih":   u(ks[2], (4 * hid_dim,)),
        "bias_hh":   u(ks[3], (4 * hid_dim,)),
    }


if __name__ == "__main__":
    # Small shapes consistent with the module: feature size 11, step 5,
    # embedding_dim 24; hidden_dim shrunk from 256 -> 32 for a small test.
    B, T, I, H, E, STEP = 8, 5, 11, 32, 24, 5

    key = jax.random.PRNGKey(0)
    kx, k1, k2 = jax.random.split(key, 3)
    time_series = jax.random.normal(kx, (B, T, I), jnp.float32)
    params = {
        "cell1": init_lstmcell_params(k1, I, H),
        "cell2": init_lstmcell_params(k2, H, E),
    }

    ref = lstm_encoder_ref(time_series, params, STEP)

    # Full-f32 path: tight check against the PyTorch-equivalent reference.
    out_f32 = jax.block_until_ready(
        lstm_encoder_forward(time_series, params, STEP,
                             matmul_dtype=jnp.float32, act_dtype=jnp.float32))
    assert out_f32.shape == (B, E)
    np.testing.assert_allclose(np.asarray(out_f32), np.asarray(ref),
                               rtol=1e-4, atol=1e-5)

    # Fast path (bf16 MXU; bf16 activations auto-enabled on v6e/v7x only).
    out_fast = jax.block_until_ready(
        lstm_encoder_forward(time_series, params, STEP))
    assert out_fast.shape == (B, E)
    np.testing.assert_allclose(np.asarray(out_fast), np.asarray(ref),
                               rtol=5e-2, atol=5e-2)

    print("KERNEL_OK")
</pallas_src>

<mosaic_0001>
module attributes {stable_mosaic.version = 11 : i64} {
  func.func @lstm_encoder_kernel(%arg0: i32, %arg1: memref<5x8x11xf32, #tpu.memory_space<vmem>>, %arg2: memref<11x128xf32, #tpu.memory_space<vmem>>, %arg3: memref<32x128xf32, #tpu.memory_space<vmem>>, %arg4: memref<1x128xf32, #tpu.memory_space<vmem>>, %arg5: memref<32x128xf32, #tpu.memory_space<vmem>>, %arg6: memref<32x128xf32, #tpu.memory_space<vmem>>, %arg7: memref<1x128xf32, #tpu.memory_space<vmem>>, %arg8: memref<8x24xf32, #tpu.memory_space<vmem>>, %arg9: memref<40x128xf32, #tpu.memory_space<vmem>>, %arg10: memref<40x32xf32, #tpu.memory_space<vmem>>, %arg11: memref<40x128xf32, #tpu.memory_space<vmem>>) attributes {dimension_semantics = [#tpu.dimension_semantics<parallel>], iteration_bounds = array<i64: 1>, scalar_prefetch = 0 : i64, scratch_operands = 3 : i64, tpu.core_type = #tpu.core_type<tc>, window_params = [{transform_indices = @transform_0, window_bounds = array<i64: 5, 8, 11>}, {pipeline_mode = #tpu.pipeline_mode<synchronous>, transform_indices = @transform_1, window_bounds = array<i64: 11, 128>}, {pipeline_mode = #tpu.pipeline_mode<synchronous>, transform_indices = @transform_2, window_bounds = array<i64: 32, 128>}, {pipeline_mode = #tpu.pipeline_mode<synchronous>, transform_indices = @transform_3, window_bounds = array<i64: 1, 128>}, {pipeline_mode = #tpu.pipeline_mode<synchronous>, transform_indices = @transform_4, window_bounds = array<i64: 32, 128>}, {pipeline_mode = #tpu.pipeline_mode<synchronous>, transform_indices = @transform_5, window_bounds = array<i64: 32, 128>}, {pipeline_mode = #tpu.pipeline_mode<synchronous>, transform_indices = @transform_6, window_bounds = array<i64: 1, 128>}, {transform_indices = @transform_7, window_bounds = array<i64: 8, 24>}]} {
    %c0 = arith.constant 0 : index
    %c0_0 = arith.constant 0 : index
    %0 = vector.load %arg2[%c0, %c0_0] : memref<11x128xf32, #tpu.memory_space<vmem>>, vector<11x128xf32>
    %c0_1 = arith.constant 0 : index
    %c0_2 = arith.constant 0 : index
    %1 = vector.load %arg3[%c0_1, %c0_2] : memref<32x128xf32, #tpu.memory_space<vmem>>, vector<32x128xf32>
    %c0_3 = arith.constant 0 : index
    %c0_4 = arith.constant 0 : index
    %2 = vector.load %arg6[%c0_3, %c0_4] : memref<32x128xf32, #tpu.memory_space<vmem>>, vector<32x128xf32>
    %c0_5 = arith.constant 0 : index
    %c0_6 = arith.constant 0 : index
    %3 = vector.load %arg4[%c0_5, %c0_6] : memref<1x128xf32, #tpu.memory_space<vmem>>, vector<1x128xf32>
    %c0_7 = arith.constant 0 : index
    %c0_8 = arith.constant 0 : index
    %c0_9 = arith.constant 0 : index
    %4 = vector.load %arg1[%c0_7, %c0_8, %c0_9] : memref<5x8x11xf32, #tpu.memory_space<vmem>>, vector<1x8x11xf32>
    %5 = vector.shape_cast %4 : vector<1x8x11xf32> to vector<8x11xf32>
    %cst = arith.constant dense<0.000000e+00> : vector<8x128xf32>
    %6 = tpu.matmul %5, %0, %cst {dimension_numbers = #tpu.dot_dimension_numbers<[1], [0], [0], [1], [0, 0, 1, 1], [], []>} : vector<8x11xf32>, vector<11x128xf32>, vector<8x128xf32> -> vector<8x128xf32>
    %7 = vector.broadcast %3 : vector<1x128xf32> to vector<8x128xf32>
    %8 = arith.addf %6, %7 : vector<8x128xf32>
    %c0_10 = arith.constant 0 : index
    %c0_11 = arith.constant 0 : index
    %9 = vector.load %arg9[%c0_10, %c0_11] : memref<40x128xf32, #tpu.memory_space<vmem>>, vector<8x128xf32>
    tpu.vector_store %arg9[%c0_10, %c0_11], %8 {strides = array<i32>} : memref<40x128xf32, #tpu.memory_space<vmem>>, vector<8x128xf32>,
    %c1 = arith.constant 1 : index
    %c0_12 = arith.constant 0 : index
    %c0_13 = arith.constant 0 : index
    %10 = vector.load %arg1[%c1, %c0_12, %c0_13] : memref<5x8x11xf32, #tpu.memory_space<vmem>>, vector<1x8x11xf32>
    %11 = vector.shape_cast %10 : vector<1x8x11xf32> to vector<8x11xf32>
    %cst_14 = arith.constant dense<0.000000e+00> : vector<8x128xf32>
    %12 = tpu.matmul %11, %0, %cst_14 {dimension_numbers = #tpu.dot_dimension_numbers<[1], [0], [0], [1], [0, 0, 1, 1], [], []>} : vector<8x11xf32>, vector<11x128xf32>, vector<8x128xf32> -> vector<8x128xf32>
    %13 = vector.broadcast %3 : vector<1x128xf32> to vector<8x128xf32>
    %14 = arith.addf %12, %13 : vector<8x128xf32>
    %c8 = arith.constant 8 : index
    %c0_15 = arith.constant 0 : index
    %15 = vector.load %arg9[%c8, %c0_15] : memref<40x128xf32, #tpu.memory_space<vmem>>, vector<8x128xf32>
    tpu.vector_store %arg9[%c8, %c0_15], %14 {strides = array<i32>} : memref<40x128xf32, #tpu.memory_space<vmem>>, vector<8x128xf32>,
    %c2 = arith.constant 2 : index
    %c0_16 = arith.constant 0 : index
    %c0_17 = arith.constant 0 : index
    %16 = vector.load %arg1[%c2, %c0_16, %c0_17] : memref<5x8x11xf32, #tpu.memory_space<vmem>>, vector<1x8x11xf32>
    %17 = vector.shape_cast %16 : vector<1x8x11xf32> to vector<8x11xf32>
    %cst_18 = arith.constant dense<0.000000e+00> : vector<8x128xf32>
    %18 = tpu.matmul %17, %0, %cst_18 {dimension_numbers = #tpu.dot_dimension_numbers<[1], [0], [0], [1], [0, 0, 1, 1], [], []>} : vector<8x11xf32>, vector<11x128xf32>, vector<8x128xf32> -> vector<8x128xf32>
    %19 = vector.broadcast %3 : vector<1x128xf32> to vector<8x128xf32>
    %20 = arith.addf %18, %19 : vector<8x128xf32>
    %c16 = arith.constant 16 : index
    %c0_19 = arith.constant 0 : index
    %21 = vector.load %arg9[%c16, %c0_19] : memref<40x128xf32, #tpu.memory_space<vmem>>, vector<8x128xf32>
    tpu.vector_store %arg9[%c16, %c0_19], %20 {strides = array<i32>} : memref<40x128xf32, #tpu.memory_space<vmem>>, vector<8x128xf32>,
    %c3 = arith.constant 3 : index
    %c0_20 = arith.constant 0 : index
    %c0_21 = arith.constant 0 : index
    %22 = vector.load %arg1[%c3, %c0_20, %c0_21] : memref<5x8x11xf32, #tpu.memory_space<vmem>>, vector<1x8x11xf32>
    %23 = vector.shape_cast %22 : vector<1x8x11xf32> to vector<8x11xf32>
    %cst_22 = arith.constant dense<0.000000e+00> : vector<8x128xf32>
    %24 = tpu.matmul %23, %0, %cst_22 {dimension_numbers = #tpu.dot_dimension_numbers<[1], [0], [0], [1], [0, 0, 1, 1], [], []>} : vector<8x11xf32>, vector<11x128xf32>, vector<8x128xf32> -> vector<8x128xf32>
    %25 = vector.broadcast %3 : vector<1x128xf32> to vector<8x128xf32>
    %26 = arith.addf %24, %25 : vector<8x128xf32>
    %c24 = arith.constant 24 : index
    %c0_23 = arith.constant 0 : index
    %27 = vector.load %arg9[%c24, %c0_23] : memref<40x128xf32, #tpu.memory_space<vmem>>, vector<8x128xf32>
    tpu.vector_store %arg9[%c24, %c0_23], %26 {strides = array<i32>} : memref<40x128xf32, #tpu.memory_space<vmem>>, vector<8x128xf32>,
    %c4 = arith.constant 4 : index
    %c0_24 = arith.constant 0 : index
    %c0_25 = arith.constant 0 : index
    %28 = vector.load %arg1[%c4, %c0_24, %c0_25] : memref<5x8x11xf32, #tpu.memory_space<vmem>>, vector<1x8x11xf32>
    %29 = vector.shape_cast %28 : vector<1x8x11xf32> to vector<8x11xf32>
    %cst_26 = arith.constant dense<0.000000e+00> : vector<8x128xf32>
    %30 = tpu.matmul %29, %0, %cst_26 {dimension_numbers = #tpu.dot_dimension_numbers<[1], [0], [0], [1], [0, 0, 1, 1], [], []>} : vector<8x11xf32>, vector<11x128xf32>, vector<8x128xf32> -> vector<8x128xf32>
    %31 = vector.broadcast %3 : vector<1x128xf32> to vector<8x128xf32>
    %32 = arith.addf %30, %31 : vector<8x128xf32>
    %c32 = arith.constant 32 : index
    %c0_27 = arith.constant 0 : index
    %33 = vector.load %arg9[%c32, %c0_27] : memref<40x128xf32, #tpu.memory_space<vmem>>, vector<8x128xf32>
    tpu.vector_store %arg9[%c32, %c0_27], %32 {strides = array<i32>} : memref<40x128xf32, #tpu.memory_space<vmem>>, vector<8x128xf32>,
    %cst_28 = arith.constant 0.000000e+00 : f32
    %34 = vector.broadcast %cst_28 : f32 to vector<8x32xf32>
    %c0_29 = arith.constant 0 : index
    %c0_30 = arith.constant 0 : index
    %35 = vector.load %arg9[%c0_29, %c0_30] : memref<40x128xf32, #tpu.memory_space<vmem>>, vector<8x128xf32>
    %cst_31 = arith.constant dense<0.000000e+00> : vector<8x128xf32>
    %36 = tpu.matmul %34, %1, %cst_31 {dimension_numbers = #tpu.dot_dimension_numbers<[1], [0], [0], [1], [0, 0, 1, 1], [], []>} : vector<8x32xf32>, vector<32x128xf32>, vector<8x128xf32> -> vector<8x128xf32>
    %37 = arith.addf %36, %35 : vector<8x128xf32>
    %38 = math.tanh %37 : vector<8x128xf32>
    %39 = vector.extract_strided_slice %38 {offsets = [0, 0], sizes = [8, 32], strides = [1, 1]} : vector<8x128xf32> to vector<8x32xf32>
    %cst_32 = arith.constant 5.000000e-01 : f32
    %40 = vector.broadcast %cst_32 : f32 to vector<8x32xf32>
    %41 = arith.mulf %40, %39 : vector<8x32xf32>
    %cst_33 = arith.constant 5.000000e-01 : f32
    %42 = vector.broadcast %cst_33 : f32 to vector<8x32xf32>
    %43 = arith.addf %41, %42 : vector<8x32xf32>
    %44 = vector.extract_strided_slice %38 {offsets = [0, 32], sizes = [8, 32], strides = [1, 1]} : vector<8x128xf32> to vector<8x32xf32>
    %cst_34 = arith.constant 5.000000e-01 : f32
    %45 = vector.broadcast %cst_34 : f32 to vector<8x32xf32>
    %46 = arith.mulf %45, %44 : vector<8x32xf32>
    %cst_35 = arith.constant 5.000000e-01 : f32
    %47 = vector.broadcast %cst_35 : f32 to vector<8x32xf32>
    %48 = arith.addf %46, %47 : vector<8x32xf32>
    %49 = vector.extract_strided_slice %38 {offsets = [0, 64], sizes = [8, 32], strides = [1, 1]} : vector<8x128xf32> to vector<8x32xf32>
    %cst_36 = arith.constant 5.000000e-01 : f32
    %50 = vector.broadcast %cst_36 : f32 to vector<8x32xf32>
    %51 = arith.mulf %50, %49 : vector<8x32xf32>
    %cst_37 = arith.constant 5.000000e-01 : f32
    %52 = vector.broadcast %cst_37 : f32 to vector<8x32xf32>
    %53 = arith.addf %51, %52 : vector<8x32xf32>
    %54 = vector.extract_strided_slice %38 {offsets = [0, 96], sizes = [8, 32], strides = [1, 1]} : vector<8x128xf32> to vector<8x32xf32>
    %55 = arith.mulf %48, %34 : vector<8x32xf32>
    %56 = arith.mulf %43, %54 : vector<8x32xf32>
    %57 = arith.addf %55, %56 : vector<8x32xf32>
    %58 = math.tanh %57 : vector<8x32xf32>
    %59 = arith.mulf %53, %58 : vector<8x32xf32>
    %c0_38 = arith.constant 0 : index
    %c0_39 = arith.constant 0 : index
    %60 = vector.load %arg10[%c0_38, %c0_39] : memref<40x32xf32, #tpu.memory_space<vmem>>, vector<8x32xf32>
    tpu.vector_store %arg10[%c0_38, %c0_39], %59 {strides = array<i32>} : memref<40x32xf32, #tpu.memory_space<vmem>>, vector<8x32xf32>,
    %c8_40 = arith.constant 8 : index
    %c0_41 = arith.constant 0 : index
    %61 = vector.load %arg9[%c8_40, %c0_41] : memref<40x128xf32, #tpu.memory_space<vmem>>, vector<8x128xf32>
    %cst_42 = arith.constant dense<0.000000e+00> : vector<8x128xf32>
    %62 = tpu.matmul %59, %1, %cst_42 {dimension_numbers = #tpu.dot_dimension_numbers<[1], [0], [0], [1], [0, 0, 1, 1], [], []>} : vector<8x32xf32>, vector<32x128xf32>, vector<8x128xf32> -> vector<8x128xf32>
    %63 = arith.addf %62, %61 : vector<8x128xf32>
    %64 = math.tanh %63 : vector<8x128xf32>
    %65 = vector.extract_strided_slice %64 {offsets = [0, 0], sizes = [8, 32], strides = [1, 1]} : vector<8x128xf32> to vector<8x32xf32>
    %cst_43 = arith.constant 5.000000e-01 : f32
    %66 = vector.broadcast %cst_43 : f32 to vector<8x32xf32>
    %67 = arith.mulf %66, %65 : vector<8x32xf32>
    %cst_44 = arith.constant 5.000000e-01 : f32
    %68 = vector.broadcast %cst_44 : f32 to vector<8x32xf32>
    %69 = arith.addf %67, %68 : vector<8x32xf32>
    %70 = vector.extract_strided_slice %64 {offsets = [0, 32], sizes = [8, 32], strides = [1, 1]} : vector<8x128xf32> to vector<8x32xf32>
    %cst_45 = arith.constant 5.000000e-01 : f32
    %71 = vector.broadcast %cst_45 : f32 to vector<8x32xf32>
    %72 = arith.mulf %71, %70 : vector<8x32xf32>
    %cst_46 = arith.constant 5.000000e-01 : f32
    %73 = vector.broadcast %cst_46 : f32 to vector<8x32xf32>
    %74 = arith.addf %72, %73 : vector<8x32xf32>
    %75 = vector.extract_strided_slice %64 {offsets = [0, 64], sizes = [8, 32], strides = [1, 1]} : vector<8x128xf32> to vector<8x32xf32>
    %cst_47 = arith.constant 5.000000e-01 : f32
    %76 = vector.broadcast %cst_47 : f32 to vector<8x32xf32>
    %77 = arith.mulf %76, %75 : vector<8x32xf32>
    %cst_48 = arith.constant 5.000000e-01 : f32
    %78 = vector.broadcast %cst_48 : f32 to vector<8x32xf32>
    %79 = arith.addf %77, %78 : vector<8x32xf32>
    %80 = vector.extract_strided_slice %64 {offsets = [0, 96], sizes = [8, 32], strides = [1, 1]} : vector<8x128xf32> to vector<8x32xf32>
    %81 = arith.mulf %74, %57 : vector<8x32xf32>
    %82 = arith.mulf %69, %80 : vector<8x32xf32>
    %83 = arith.addf %81, %82 : vector<8x32xf32>
    %84 = math.tanh %83 : vector<8x32xf32>
    %85 = arith.mulf %79, %84 : vector<8x32xf32>
    %c8_49 = arith.constant 8 : index
    %c0_50 = arith.constant 0 : index
    %86 = vector.load %arg10[%c8_49, %c0_50] : memref<40x32xf32, #tpu.memory_space<vmem>>, vector<8x32xf32>
    tpu.vector_store %arg10[%c8_49, %c0_50], %85 {strides = array<i32>} : memref<40x32xf32, #tpu.memory_space<vmem>>, vector<8x32xf32>,
    %c16_51 = arith.constant 16 : index
    %c0_52 = arith.constant 0 : index
    %87 = vector.load %arg9[%c16_51, %c0_52] : memref<40x128xf32, #tpu.memory_space<vmem>>, vector<8x128xf32>
    %cst_53 = arith.constant dense<0.000000e+00> : vector<8x128xf32>
    %88 = tpu.matmul %85, %1, %cst_53 {dimension_numbers = #tpu.dot_dimension_numbers<[1], [0], [0], [1], [0, 0, 1, 1], [], []>} : vector<8x32xf32>, vector<32x128xf32>, vector<8x128xf32> -> vector<8x128xf32>
    %89 = arith.addf %88, %87 : vector<8x128xf32>
    %90 = math.tanh %89 : vector<8x128xf32>
    %91 = vector.extract_strided_slice %90 {offsets = [0, 0], sizes = [8, 32], strides = [1, 1]} : vector<8x128xf32> to vector<8x32xf32>
    %cst_54 = arith.constant 5.000000e-01 : f32
    %92 = vector.broadcast %cst_54 : f32 to vector<8x32xf32>
    %93 = arith.mulf %92, %91 : vector<8x32xf32>
    %cst_55 = arith.constant 5.000000e-01 : f32
    %94 = vector.broadcast %cst_55 : f32 to vector<8x32xf32>
    %95 = arith.addf %93, %94 : vector<8x32xf32>
    %96 = vector.extract_strided_slice %90 {offsets = [0, 32], sizes = [8, 32], strides = [1, 1]} : vector<8x128xf32> to vector<8x32xf32>
    %cst_56 = arith.constant 5.000000e-01 : f32
    %97 = vector.broadcast %cst_56 : f32 to vector<8x32xf32>
    %98 = arith.mulf %97, %96 : vector<8x32xf32>
    %cst_57 = arith.constant 5.000000e-01 : f32
    %99 = vector.broadcast %cst_57 : f32 to vector<8x32xf32>
    %100 = arith.addf %98, %99 : vector<8x32xf32>
    %101 = vector.extract_strided_slice %90 {offsets = [0, 64], sizes = [8, 32], strides = [1, 1]} : vector<8x128xf32> to vector<8x32xf32>
    %cst_58 = arith.constant 5.000000e-01 : f32
    %102 = vector.broadcast %cst_58 : f32 to vector<8x32xf32>
    %103 = arith.mulf %102, %101 : vector<8x32xf32>
    %cst_59 = arith.constant 5.000000e-01 : f32
    %104 = vector.broadcast %cst_59 : f32 to vector<8x32xf32>
    %105 = arith.addf %103, %104 : vector<8x32xf32>
    %106 = vector.extract_strided_slice %90 {offsets = [0, 96], sizes = [8, 32], strides = [1, 1]} : vector<8x128xf32> to vector<8x32xf32>
    %107 = arith.mulf %100, %83 : vector<8x32xf32>
    %108 = arith.mulf %95, %106 : vector<8x32xf32>
    %109 = arith.addf %107, %108 : vector<8x32xf32>
    %110 = math.tanh %109 : vector<8x32xf32>
    %111 = arith.mulf %105, %110 : vector<8x32xf32>
    %c16_60 = arith.constant 16 : index
    %c0_61 = arith.constant 0 : index
    %112 = vector.load %arg10[%c16_60, %c0_61] : memref<40x32xf32, #tpu.memory_space<vmem>>, vector<8x32xf32>
    tpu.vector_store %arg10[%c16_60, %c0_61], %111 {strides = array<i32>} : memref<40x32xf32, #tpu.memory_space<vmem>>, vector<8x32xf32>,
    %c24_62 = arith.constant 24 : index
    %c0_63 = arith.constant 0 : index
    %113 = vector.load %arg9[%c24_62, %c0_63] : memref<40x128xf32, #tpu.memory_space<vmem>>, vector<8x128xf32>
    %cst_64 = arith.constant dense<0.000000e+00> : vector<8x128xf32>
    %114 = tpu.matmul %111, %1, %cst_64 {dimension_numbers = #tpu.dot_dimension_numbers<[1], [0], [0], [1], [0, 0, 1, 1], [], []>} : vector<8x32xf32>, vector<32x128xf32>, vector<8x128xf32> -> vector<8x128xf32>
    %115 = arith.addf %114, %113 : vector<8x128xf32>
    %116 = math.tanh %115 : vector<8x128xf32>
    %117 = vector.extract_strided_slice %116 {offsets = [0, 0], sizes = [8, 32], strides = [1, 1]} : vector<8x128xf32> to vector<8x32xf32>
    %cst_65 = arith.constant 5.000000e-01 : f32
    %118 = vector.broadcast %cst_65 : f32 to vector<8x32xf32>
    %119 = arith.mulf %118, %117 : vector<8x32xf32>
    %cst_66 = arith.constant 5.000000e-01 : f32
    %120 = vector.broadcast %cst_66 : f32 to vector<8x32xf32>
    %121 = arith.addf %119, %120 : vector<8x32xf32>
    %122 = vector.extract_strided_slice %116 {offsets = [0, 32], sizes = [8, 32], strides = [1, 1]} : vector<8x128xf32> to vector<8x32xf32>
    %cst_67 = arith.constant 5.000000e-01 : f32
    %123 = vector.broadcast %cst_67 : f32 to vector<8x32xf32>
    %124 = arith.mulf %123, %122 : vector<8x32xf32>
    %cst_68 = arith.constant 5.000000e-01 : f32
    %125 = vector.broadcast %cst_68 : f32 to vector<8x32xf32>
    %126 = arith.addf %124, %125 : vector<8x32xf32>
    %127 = vector.extract_strided_slice %116 {offsets = [0, 64], sizes = [8, 32], strides = [1, 1]} : vector<8x128xf32> to vector<8x32xf32>
    %cst_69 = arith.constant 5.000000e-01 : f32
    %128 = vector.broadcast %cst_69 : f32 to vector<8x32xf32>
    %129 = arith.mulf %128, %127 : vector<8x32xf32>
    %cst_70 = arith.constant 5.000000e-01 : f32
    %130 = vector.broadcast %cst_70 : f32 to vector<8x32xf32>
    %131 = arith.addf %129, %130 : vector<8x32xf32>
    %132 = vector.extract_strided_slice %116 {offsets = [0, 96], sizes = [8, 32], strides = [1, 1]} : vector<8x128xf32> to vector<8x32xf32>
    %133 = arith.mulf %126, %109 : vector<8x32xf32>
    %134 = arith.mulf %121, %132 : vector<8x32xf32>
    %135 = arith.addf %133, %134 : vector<8x32xf32>
    %136 = math.tanh %135 : vector<8x32xf32>
    %137 = arith.mulf %131, %136 : vector<8x32xf32>
    %c24_71 = arith.constant 24 : index
    %c0_72 = arith.constant 0 : index
    %138 = vector.load %arg10[%c24_71, %c0_72] : memref<40x32xf32, #tpu.memory_space<vmem>>, vector<8x32xf32>
    tpu.vector_store %arg10[%c24_71, %c0_72], %137 {strides = array<i32>} : memref<40x32xf32, #tpu.memory_space<vmem>>, vector<8x32xf32>,
    %c32_73 = arith.constant 32 : index
    %c0_74 = arith.constant 0 : index
    %139 = vector.load %arg9[%c32_73, %c0_74] : memref<40x128xf32, #tpu.memory_space<vmem>>, vector<8x128xf32>
    %cst_75 = arith.constant dense<0.000000e+00> : vector<8x128xf32>
    %140 = tpu.matmul %137, %1, %cst_75 {dimension_numbers = #tpu.dot_dimension_numbers<[1], [0], [0], [1], [0, 0, 1, 1], [], []>} : vector<8x32xf32>, vector<32x128xf32>, vector<8x128xf32> -> vector<8x128xf32>
    %141 = arith.addf %140, %139 : vector<8x128xf32>
    %142 = math.tanh %141 : vector<8x128xf32>
    %143 = vector.extract_strided_slice %142 {offsets = [0, 0], sizes = [8, 32], strides = [1, 1]} : vector<8x128xf32> to vector<8x32xf32>
    %cst_76 = arith.constant 5.000000e-01 : f32
    %144 = vector.broadcast %cst_76 : f32 to vector<8x32xf32>
    %145 = arith.mulf %144, %143 : vector<8x32xf32>
    %cst_77 = arith.constant 5.000000e-01 : f32
    %146 = vector.broadcast %cst_77 : f32 to vector<8x32xf32>
    %147 = arith.addf %145, %146 : vector<8x32xf32>
    %148 = vector.extract_strided_slice %142 {offsets = [0, 32], sizes = [8, 32], strides = [1, 1]} : vector<8x128xf32> to vector<8x32xf32>
    %cst_78 = arith.constant 5.000000e-01 : f32
    %149 = vector.broadcast %cst_78 : f32 to vector<8x32xf32>
    %150 = arith.mulf %149, %148 : vector<8x32xf32>
    %cst_79 = arith.constant 5.000000e-01 : f32
    %151 = vector.broadcast %cst_79 : f32 to vector<8x32xf32>
    %152 = arith.addf %150, %151 : vector<8x32xf32>
    %153 = vector.extract_strided_slice %142 {offsets = [0, 64], sizes = [8, 32], strides = [1, 1]} : vector<8x128xf32> to vector<8x32xf32>
    %cst_80 = arith.constant 5.000000e-01 : f32
    %154 = vector.broadcast %cst_80 : f32 to vector<8x32xf32>
    %155 = arith.mulf %154, %153 : vector<8x32xf32>
    %cst_81 = arith.constant 5.000000e-01 : f32
    %156 = vector.broadcast %cst_81 : f32 to vector<8x32xf32>
    %157 = arith.addf %155, %156 : vector<8x32xf32>
    %158 = vector.extract_strided_slice %142 {offsets = [0, 96], sizes = [8, 32], strides = [1, 1]} : vector<8x128xf32> to vector<8x32xf32>
    %159 = arith.mulf %152, %135 : vector<8x32xf32>
    %160 = arith.mulf %147, %158 : vector<8x32xf32>
    %161 = arith.addf %159, %160 : vector<8x32xf32>
    %162 = math.tanh %161 : vector<8x32xf32>
    %163 = arith.mulf %157, %162 : vector<8x32xf32>
    %c32_82 = arith.constant 32 : index
    %c0_83 = arith.constant 0 : index
    %164 = vector.load %arg10[%c32_82, %c0_83] : memref<40x32xf32, #tpu.memory_space<vmem>>, vector<8x32xf32>
    tpu.vector_store %arg10[%c32_82, %c0_83], %163 {strides = array<i32>} : memref<40x32xf32, #tpu.memory_space<vmem>>, vector<8x32xf32>,
    %c0_84 = arith.constant 0 : index
    %c0_85 = arith.constant 0 : index
    %165 = vector.load %arg10[%c0_84, %c0_85] : memref<40x32xf32, #tpu.memory_space<vmem>>, vector<40x32xf32>
    %c0_86 = arith.constant 0 : index
    %c0_87 = arith.constant 0 : index
    %166 = vector.load %arg5[%c0_86, %c0_87] : memref<32x128xf32, #tpu.memory_space<vmem>>, vector<32x128xf32>
    %cst_88 = arith.constant dense<0.000000e+00> : vector<40x128xf32>
    %167 = tpu.matmul %165, %166, %cst_88 {dimension_numbers = #tpu.dot_dimension_numbers<[1], [0], [0], [1], [0, 0, 1, 1], [], []>} : vector<40x32xf32>, vector<32x128xf32>, vector<40x128xf32> -> vector<40x128xf32>
    %c0_89 = arith.constant 0 : index
    %c0_90 = arith.constant 0 : index
    %168 = vector.load %arg7[%c0_89, %c0_90] : memref<1x128xf32, #tpu.memory_space<vmem>>, vector<1x128xf32>
    %169 = vector.broadcast %168 : vector<1x128xf32> to vector<40x128xf32>
    %170 = arith.addf %167, %169 : vector<40x128xf32>
    %c0_91 = arith.constant 0 : index
    %c0_92 = arith.constant 0 : index
    %171 = vector.load %arg11[%c0_91, %c0_92] : memref<40x128xf32, #tpu.memory_space<vmem>>, vector<40x128xf32>
    tpu.vector_store %arg11[%c0_91, %c0_92], %170 {strides = array<i32>} : memref<40x128xf32, #tpu.memory_space<vmem>>, vector<40x128xf32>,
    %cst_93 = arith.constant 0.000000e+00 : f32
    %172 = vector.broadcast %cst_93 : f32 to vector<8x32xf32>
    %c0_94 = arith.constant 0 : index
    %c0_95 = arith.constant 0 : index
    %173 = vector.load %arg11[%c0_94, %c0_95] : memref<40x128xf32, #tpu.memory_space<vmem>>, vector<8x128xf32>
    %cst_96 = arith.constant dense<0.000000e+00> : vector<8x128xf32>
    %174 = tpu.matmul %172, %2, %cst_96 {dimension_numbers = #tpu.dot_dimension_numbers<[1], [0], [0], [1], [0, 0, 1, 1], [], []>} : vector<8x32xf32>, vector<32x128xf32>, vector<8x128xf32> -> vector<8x128xf32>
    %175 = arith.addf %174, %173 : vector<8x128xf32>
    %176 = math.tanh %175 : vector<8x128xf32>
    %177 = vector.extract_strided_slice %176 {offsets = [0, 0], sizes = [8, 32], strides = [1, 1]} : vector<8x128xf32> to vector<8x32xf32>
    %cst_97 = arith.constant 5.000000e-01 : f32
    %178 = vector.broadcast %cst_97 : f32 to vector<8x32xf32>
    %179 = arith.mulf %178, %177 : vector<8x32xf32>
    %cst_98 = arith.constant 5.000000e-01 : f32
    %180 = vector.broadcast %cst_98 : f32 to vector<8x32xf32>
    %181 = arith.addf %179, %180 : vector<8x32xf32>
    %182 = vector.extract_strided_slice %176 {offsets = [0, 32], sizes = [8, 32], strides = [1, 1]} : vector<8x128xf32> to vector<8x32xf32>
    %cst_99 = arith.constant 5.000000e-01 : f32
    %183 = vector.broadcast %cst_99 : f32 to vector<8x32xf32>
    %184 = arith.mulf %183, %182 : vector<8x32xf32>
    %cst_100 = arith.constant 5.000000e-01 : f32
    %185 = vector.broadcast %cst_100 : f32 to vector<8x32xf32>
    %186 = arith.addf %184, %185 : vector<8x32xf32>
    %187 = vector.extract_strided_slice %176 {offsets = [0, 64], sizes = [8, 32], strides = [1, 1]} : vector<8x128xf32> to vector<8x32xf32>
    %cst_101 = arith.constant 5.000000e-01 : f32
    %188 = vector.broadcast %cst_101 : f32 to vector<8x32xf32>
    %189 = arith.mulf %188, %187 : vector<8x32xf32>
    %cst_102 = arith.constant 5.000000e-01 : f32
    %190 = vector.broadcast %cst_102 : f32 to vector<8x32xf32>
    %191 = arith.addf %189, %190 : vector<8x32xf32>
    %192 = vector.extract_strided_slice %176 {offsets = [0, 96], sizes = [8, 32], strides = [1, 1]} : vector<8x128xf32> to vector<8x32xf32>
    %193 = arith.mulf %186, %172 : vector<8x32xf32>
    %194 = arith.mulf %181, %192 : vector<8x32xf32>
    %195 = arith.addf %193, %194 : vector<8x32xf32>
    %196 = math.tanh %195 : vector<8x32xf32>
    %197 = arith.mulf %191, %196 : vector<8x32xf32>
    %c8_103 = arith.constant 8 : index
    %c0_104 = arith.constant 0 : index
    %198 = vector.load %arg11[%c8_103, %c0_104] : memref<40x128xf32, #tpu.memory_space<vmem>>, vector<8x128xf32>
    %cst_105 = arith.constant dense<0.000000e+00> : vector<8x128xf32>
    %199 = tpu.matmul %197, %2, %cst_105 {dimension_numbers = #tpu.dot_dimension_numbers<[1], [0], [0], [1], [0, 0, 1, 1], [], []>} : vector<8x32xf32>, vector<32x128xf32>, vector<8x128xf32> -> vector<8x128xf32>
    %200 = arith.addf %199, %198 : vector<8x128xf32>
    %201 = math.tanh %200 : vector<8x128xf32>
    %202 = vector.extract_strided_slice %201 {offsets = [0, 0], sizes = [8, 32], strides = [1, 1]} : vector<8x128xf32> to vector<8x32xf32>
    %cst_106 = arith.constant 5.000000e-01 : f32
    %203 = vector.broadcast %cst_106 : f32 to vector<8x32xf32>
    %204 = arith.mulf %203, %202 : vector<8x32xf32>
    %cst_107 = arith.constant 5.000000e-01 : f32
    %205 = vector.broadcast %cst_107 : f32 to vector<8x32xf32>
    %206 = arith.addf %204, %205 : vector<8x32xf32>
    %207 = vector.extract_strided_slice %201 {offsets = [0, 32], sizes = [8, 32], strides = [1, 1]} : vector<8x128xf32> to vector<8x32xf32>
    %cst_108 = arith.constant 5.000000e-01 : f32
    %208 = vector.broadcast %cst_108 : f32 to vector<8x32xf32>
    %209 = arith.mulf %208, %207 : vector<8x32xf32>
    %cst_109 = arith.constant 5.000000e-01 : f32
    %210 = vector.broadcast %cst_109 : f32 to vector<8x32xf32>
    %211 = arith.addf %209, %210 : vector<8x32xf32>
    %212 = vector.extract_strided_slice %201 {offsets = [0, 64], sizes = [8, 32], strides = [1, 1]} : vector<8x128xf32> to vector<8x32xf32>
    %cst_110 = arith.constant 5.000000e-01 : f32
    %213 = vector.broadcast %cst_110 : f32 to vector<8x32xf32>
    %214 = arith.mulf %213, %212 : vector<8x32xf32>
    %cst_111 = arith.constant 5.000000e-01 : f32
    %215 = vector.broadcast %cst_111 : f32 to vector<8x32xf32>
    %216 = arith.addf %214, %215 : vector<8x32xf32>
    %217 = vector.extract_strided_slice %201 {offsets = [0, 96], sizes = [8, 32], strides = [1, 1]} : vector<8x128xf32> to vector<8x32xf32>
    %218 = arith.mulf %211, %195 : vector<8x32xf32>
    %219 = arith.mulf %206, %217 : vector<8x32xf32>
    %220 = arith.addf %218, %219 : vector<8x32xf32>
    %221 = math.tanh %220 : vector<8x32xf32>
    %222 = arith.mulf %216, %221 : vector<8x32xf32>
    %c16_112 = arith.constant 16 : index
    %c0_113 = arith.constant 0 : index
    %223 = vector.load %arg11[%c16_112, %c0_113] : memref<40x128xf32, #tpu.memory_space<vmem>>, vector<8x128xf32>
    %cst_114 = arith.constant dense<0.000000e+00> : vector<8x128xf32>
    %224 = tpu.matmul %222, %2, %cst_114 {dimension_numbers = #tpu.dot_dimension_numbers<[1], [0], [0], [1], [0, 0, 1, 1], [], []>} : vector<8x32xf32>, vector<32x128xf32>, vector<8x128xf32> -> vector<8x128xf32>
    %225 = arith.addf %224, %223 : vector<8x128xf32>
    %226 = math.tanh %225 : vector<8x128xf32>
    %227 = vector.extract_strided_slice %226 {offsets = [0, 0], sizes = [8, 32], strides = [1, 1]} : vector<8x128xf32> to vector<8x32xf32>
    %cst_115 = arith.constant 5.000000e-01 : f32
    %228 = vector.broadcast %cst_115 : f32 to vector<8x32xf32>
    %229 = arith.mulf %228, %227 : vector<8x32xf32>
    %cst_116 = arith.constant 5.000000e-01 : f32
    %230 = vector.broadcast %cst_116 : f32 to vector<8x32xf32>
    %231 = arith.addf %229, %230 : vector<8x32xf32>
    %232 = vector.extract_strided_slice %226 {offsets = [0, 32], sizes = [8, 32], strides = [1, 1]} : vector<8x128xf32> to vector<8x32xf32>
    %cst_117 = arith.constant 5.000000e-01 : f32
    %233 = vector.broadcast %cst_117 : f32 to vector<8x32xf32>
    %234 = arith.mulf %233, %232 : vector<8x32xf32>
    %cst_118 = arith.constant 5.000000e-01 : f32
    %235 = vector.broadcast %cst_118 : f32 to vector<8x32xf32>
    %236 = arith.addf %234, %235 : vector<8x32xf32>
    %237 = vector.extract_strided_slice %226 {offsets = [0, 64], sizes = [8, 32], strides = [1, 1]} : vector<8x128xf32> to vector<8x32xf32>
    %cst_119 = arith.constant 5.000000e-01 : f32
    %238 = vector.broadcast %cst_119 : f32 to vector<8x32xf32>
    %239 = arith.mulf %238, %237 : vector<8x32xf32>
    %cst_120 = arith.constant 5.000000e-01 : f32
    %240 = vector.broadcast %cst_120 : f32 to vector<8x32xf32>
    %241 = arith.addf %239, %240 : vector<8x32xf32>
    %242 = vector.extract_strided_slice %226 {offsets = [0, 96], sizes = [8, 32], strides = [1, 1]} : vector<8x128xf32> to vector<8x32xf32>
    %243 = arith.mulf %236, %220 : vector<8x32xf32>
    %244 = arith.mulf %231, %242 : vector<8x32xf32>
    %245 = arith.addf %243, %244 : vector<8x32xf32>
    %246 = math.tanh %245 : vector<8x32xf32>
    %247 = arith.mulf %241, %246 : vector<8x32xf32>
    %c24_121 = arith.constant 24 : index
    %c0_122 = arith.constant 0 : index
    %248 = vector.load %arg11[%c24_121, %c0_122] : memref<40x128xf32, #tpu.memory_space<vmem>>, vector<8x128xf32>
    %cst_123 = arith.constant dense<0.000000e+00> : vector<8x128xf32>
    %249 = tpu.matmul %247, %2, %cst_123 {dimension_numbers = #tpu.dot_dimension_numbers<[1], [0], [0], [1], [0, 0, 1, 1], [], []>} : vector<8x32xf32>, vector<32x128xf32>, vector<8x128xf32> -> vector<8x128xf32>
    %250 = arith.addf %249, %248 : vector<8x128xf32>
    %251 = math.tanh %250 : vector<8x128xf32>
    %252 = vector.extract_strided_slice %251 {offsets = [0, 0], sizes = [8, 32], strides = [1, 1]} : vector<8x128xf32> to vector<8x32xf32>
    %cst_124 = arith.constant 5.000000e-01 : f32
    %253 = vector.broadcast %cst_124 : f32 to vector<8x32xf32>
    %254 = arith.mulf %253, %252 : vector<8x32xf32>
    %cst_125 = arith.constant 5.000000e-01 : f32
    %255 = vector.broadcast %cst_125 : f32 to vector<8x32xf32>
    %256 = arith.addf %254, %255 : vector<8x32xf32>
    %257 = vector.extract_strided_slice %251 {offsets = [0, 32], sizes = [8, 32], strides = [1, 1]} : vector<8x128xf32> to vector<8x32xf32>
    %cst_126 = arith.constant 5.000000e-01 : f32
    %258 = vector.broadcast %cst_126 : f32 to vector<8x32xf32>
    %259 = arith.mulf %258, %257 : vector<8x32xf32>
    %cst_127 = arith.constant 5.000000e-01 : f32
    %260 = vector.broadcast %cst_127 : f32 to vector<8x32xf32>
    %261 = arith.addf %259, %260 : vector<8x32xf32>
    %262 = vector.extract_strided_slice %251 {offsets = [0, 64], sizes = [8, 32], strides = [1, 1]} : vector<8x128xf32> to vector<8x32xf32>
    %cst_128 = arith.constant 5.000000e-01 : f32
    %263 = vector.broadcast %cst_128 : f32 to vector<8x32xf32>
    %264 = arith.mulf %263, %262 : vector<8x32xf32>
    %cst_129 = arith.constant 5.000000e-01 : f32
    %265 = vector.broadcast %cst_129 : f32 to vector<8x32xf32>
    %266 = arith.addf %264, %265 : vector<8x32xf32>
    %267 = vector.extract_strided_slice %251 {offsets = [0, 96], sizes = [8, 32], strides = [1, 1]} : vector<8x128xf32> to vector<8x32xf32>
    %268 = arith.mulf %261, %245 : vector<8x32xf32>
    %269 = arith.mulf %256, %267 : vector<8x32xf32>
    %270 = arith.addf %268, %269 : vector<8x32xf32>
    %271 = math.tanh %270 : vector<8x32xf32>
    %272 = arith.mulf %266, %271 : vector<8x32xf32>
    %c32_130 = arith.constant 32 : index
    %c0_131 = arith.constant 0 : index
    %273 = vector.load %arg11[%c32_130, %c0_131] : memref<40x128xf32, #tpu.memory_space<vmem>>, vector<8x128xf32>
    %cst_132 = arith.constant dense<0.000000e+00> : vector<8x128xf32>
    %274 = tpu.matmul %272, %2, %cst_132 {dimension_numbers = #tpu.dot_dimension_numbers<[1], [0], [0], [1], [0, 0, 1, 1], [], []>} : vector<8x32xf32>, vector<32x128xf32>, vector<8x128xf32> -> vector<8x128xf32>
    %275 = arith.addf %274, %273 : vector<8x128xf32>
    %276 = math.tanh %275 : vector<8x128xf32>
    %277 = vector.extract_strided_slice %276 {offsets = [0, 0], sizes = [8, 32], strides = [1, 1]} : vector<8x128xf32> to vector<8x32xf32>
    %cst_133 = arith.constant 5.000000e-01 : f32
    %278 = vector.broadcast %cst_133 : f32 to vector<8x32xf32>
    %279 = arith.mulf %278, %277 : vector<8x32xf32>
    %cst_134 = arith.constant 5.000000e-01 : f32
    %280 = vector.broadcast %cst_134 : f32 to vector<8x32xf32>
    %281 = arith.addf %279, %280 : vector<8x32xf32>
    %282 = vector.extract_strided_slice %276 {offsets = [0, 32], sizes = [8, 32], strides = [1, 1]} : vector<8x128xf32> to vector<8x32xf32>
    %cst_135 = arith.constant 5.000000e-01 : f32
    %283 = vector.broadcast %cst_135 : f32 to vector<8x32xf32>
    %284 = arith.mulf %283, %282 : vector<8x32xf32>
    %cst_136 = arith.constant 5.000000e-01 : f32
    %285 = vector.broadcast %cst_136 : f32 to vector<8x32xf32>
    %286 = arith.addf %284, %285 : vector<8x32xf32>
    %287 = vector.extract_strided_slice %276 {offsets = [0, 64], sizes = [8, 32], strides = [1, 1]} : vector<8x128xf32> to vector<8x32xf32>
    %cst_137 = arith.constant 5.000000e-01 : f32
    %288 = vector.broadcast %cst_137 : f32 to vector<8x32xf32>
    %289 = arith.mulf %288, %287 : vector<8x32xf32>
    %cst_138 = arith.constant 5.000000e-01 : f32
    %290 = vector.broadcast %cst_138 : f32 to vector<8x32xf32>
    %291 = arith.addf %289, %290 : vector<8x32xf32>
    %292 = vector.extract_strided_slice %276 {offsets = [0, 96], sizes = [8, 32], strides = [1, 1]} : vector<8x128xf32> to vector<8x32xf32>
    %293 = arith.mulf %286, %270 : vector<8x32xf32>
    %294 = arith.mulf %281, %292 : vector<8x32xf32>
    %295 = arith.addf %293, %294 : vector<8x32xf32>
    %296 = math.tanh %295 : vector<8x32xf32>
    %297 = arith.mulf %291, %296 : vector<8x32xf32>
    %298 = vector.extract_strided_slice %297 {offsets = [0, 0], sizes = [8, 24], strides = [1, 1]} : vector<8x32xf32> to vector<8x24xf32>
    %c0_139 = arith.constant 0 : index
    %c0_140 = arith.constant 0 : index
    %299 = vector.load %arg8[%c0_139, %c0_140] : memref<8x24xf32, #tpu.memory_space<vmem>>, vector<8x24xf32>
    tpu.vector_store %arg8[%c0_139, %c0_140], %298 {strides = array<i32>} : memref<8x24xf32, #tpu.memory_space<vmem>>, vector<8x24xf32>,
    return
  }
  func.func @transform_0(%arg0: i32) -> (i32, i32, i32) {
    %c0_i32 = arith.constant 0 : i32
    %c0_i32_0 = arith.constant 0 : i32
    %c0_i32_1 = arith.constant 0 : i32
    return %c0_i32, %arg0, %c0_i32_0 : i32, i32, i32
  }
  func.func @transform_1(%arg0: i32) -> (i32, i32) {
    %c0_i32 = arith.constant 0 : i32
    %c0_i32_0 = arith.constant 0 : i32
    %c0_i32_1 = arith.constant 0 : i32
    return %c0_i32, %c0_i32_0 : i32, i32
  }
  func.func @transform_2(%arg0: i32) -> (i32, i32) {
    %c0_i32 = arith.constant 0 : i32
    %c0_i32_0 = arith.constant 0 : i32
    %c0_i32_1 = arith.constant 0 : i32
    return %c0_i32, %c0_i32_0 : i32, i32
  }
  func.func @transform_3(%arg0: i32) -> (i32, i32) {
    %c0_i32 = arith.constant 0 : i32
    %c0_i32_0 = arith.constant 0 : i32
    %c0_i32_1 = arith.constant 0 : i32
    return %c0_i32, %c0_i32_0 : i32, i32
  }
  func.func @transform_4(%arg0: i32) -> (i32, i32) {
    %c0_i32 = arith.constant 0 : i32
    %c0_i32_0 = arith.constant 0 : i32
    %c0_i32_1 = arith.constant 0 : i32
    return %c0_i32, %c0_i32_0 : i32, i32
  }
  func.func @transform_5(%arg0: i32) -> (i32, i32) {
    %c0_i32 = arith.constant 0 : i32
    %c0_i32_0 = arith.constant 0 : i32
    %c0_i32_1 = arith.constant 0 : i32
    return %c0_i32, %c0_i32_0 : i32, i32
  }
  func.func @transform_6(%arg0: i32) -> (i32, i32) {
    %c0_i32 = arith.constant 0 : i32
    %c0_i32_0 = arith.constant 0 : i32
    %c0_i32_1 = arith.constant 0 : i32
    return %c0_i32, %c0_i32_0 : i32, i32
  }
  func.func @transform_7(%arg0: i32) -> (i32, i32) {
    %c0_i32 = arith.constant 0 : i32
    %c0_i32_0 = arith.constant 0 : i32
    return %arg0, %c0_i32 : i32, i32
  }
}

</mosaic_0001>

<bundles_post_ra>
// kernel: tpu_custom_call.1
= control target key start
LH: loop header
LB: loop body
LE: loop exit
PB: predicated region body
PF: predicated region fallthrough
CT: control target
= control target key end

     0   :  { %12 = vsyncpa [#allocation6], 0  ;;  %s2426_s0 = inlined_call_operand.hbm [shape: f32[5,8,11], index: 0, kind: input, shape index: {}]   ;;  %s2427_s1 = inlined_call_operand.hbm [shape: f32[11,128], index: 1, kind: input, shape index: {}]   ;;  %s2428_s2 = inlined_call_operand.hbm [shape: f32[32,128], index: 2, kind: input, shape index: {}]   ;;  %s2429_s3 = inlined_call_operand.vmem [shape: f32[1,128], index: 3, kind: input, shape index: {}]   ;;  %s2430_s4 = inlined_call_operand.hbm [shape: f32[32,128], index: 4, kind: input, shape index: {}]   ;;  %s2431_s5 = inlined_call_operand.hbm [shape: f32[32,128], index: 5, kind: input, shape index: {}]   ;;  %s2432_s6 = inlined_call_operand.vmem [shape: f32[1,128], index: 6, kind: input, shape index: {}]   ;;  %s2433_s7 = inlined_call_operand.hbm [shape: f32[8,24], index: 7, kind: output, shape index: {}]  }
   0x1   :  { %13 = vsyncpa [#allocation9], 0 }
   0x2   :  { %14 = vsyncpa [#allocation12], 0 }
   0x3   :  { %15 = vsyncpa [#allocation7], 0  ;;  %s2059_s24 = smov [#allocation8]   ;;  %s2060_s26 = smov [#allocation11]  }
   0x4   :  { %s33_s25 = sshll.u32 %s2059_s24, 4  ;;  %s59_s27 = sshll.u32 %s2060_s26, 4  ;;  %s34_s25 = int_to_ptr.vmem [resolvable:$true] %s33_s25  ;;  %s60_s27 = int_to_ptr.vmem [resolvable:$true] %s59_s27 }
   0x5   :  { %s1939_s28 = scalar_lea.vmem %s34_s25, 256  ;;  %p1944_p1 = scmp.lt.s32.totalorder %s34_s25, %s34_s25 }
   0x6   :  { %p1940_p0 = scmp.ne.s32.totalorder %s34_s25, %s1939_s28  ;;  %p1945_p2 = scmp.lt.s32.totalorder %s1939_s28, %s1939_s28 }
   0x8   :  { %p1946_p3 = por %p1945_p2, %p1944_p1 }
   0xa   :  { %p1947_p4 = pnand %p1946_p3, %p1940_p0 }
   0xc   :  { %1950 = shalt.err (!%p1947_p4)
}
   0xd   :  { %s2061_s29 = smov 128   ;;  %s2062_s30 = smov 8  }
   0xe   :  { %39 = dma.hbm_to_vmem [thread:$0]  %s2427_s1, 256, %s34_s25, [#allocation9], %s2061_s29, %s2061_s29, %s2062_s30  }
   0xf   :  { %s1959_s10 = scalar_lea.vmem %s60_s27, 512  ;;  %p1964_p6 = scmp.lt.s32.totalorder %s60_s27, %s60_s27 }
  0x10   :  { %p1960_p5 = scmp.ne.s32.totalorder %s60_s27, %s1959_s10  ;;  %p1965_p7 = scmp.lt.s32.totalorder %s1959_s10, %s1959_s10 }
  0x12   :  { %p1966_p8 = por %p1965_p7, %p1964_p6 }
  0x14   :  { %p1967_p9 = pnand %p1966_p8, %p1960_p5 }
  0x16   :  { %1970 = shalt.err (!%p1967_p9)
}
  0x17   :  { %65 = dma.hbm_to_vmem [thread:$0]  %s2430_s4, 512, %s60_s27, [#allocation12], %s2061_s29, %s2061_s29, %s2062_s30  }
  0x18   :  { %s2063_s13 = smov [#allocation5]   ;;  %s2064_s15 = smov [#allocation10]  }
  0x19   :  { %s21_s14 = sshll.u32 %s2063_s13, 4  ;;  %s45_s16 = sshll.u32 %s2064_s15, 4  ;;  %s22_s14 = int_to_ptr.vmem [resolvable:$true] %s21_s14  ;;  %s46_s16 = int_to_ptr.vmem [resolvable:$true] %s45_s16 }
  0x1a   :  { %s1979_s1 = scalar_lea.vmem %s22_s14, 640  ;;  %p1984_p11 = scmp.lt.s32.totalorder %s22_s14, %s22_s14 }
  0x1b   :  { %p1980_p10 = scmp.ne.s32.totalorder %s22_s14, %s1979_s1  ;;  %p1985_p12 = scmp.lt.s32.totalorder %s1979_s1, %s1979_s1 }
  0x1d   :  { %p1986_p13 = por %p1985_p12, %p1984_p11 }
  0x1f   :  { %p1987_p0 = pnand %p1986_p13, %p1980_p10 }
  0x21   :  { %1990 = shalt.err (!%p1987_p0)
}
  0x22   :  { %27 = dma.hbm_to_vmem [thread:$0]  %s2426_s0, 640, %s22_s14, [#allocation6], %s2061_s29, %s2061_s29, %s2062_s30  }
  0x23   :  { %s1999_s4 = scalar_lea.vmem %s46_s16, 512  ;;  %p2004_p2 = scmp.lt.s32.totalorder %s46_s16, %s46_s16 }
  0x24   :  { %p2000_p1 = scmp.ne.s32.totalorder %s46_s16, %s1999_s4  ;;  %p2005_p3 = scmp.lt.s32.totalorder %s1999_s4, %s1999_s4 }
  0x26   :  { %p2006_p4 = por %p2005_p3, %p2004_p2 }
  0x28   :  { %p2007_p5 = pnand %p2006_p4, %p2000_p1 }
  0x2a   :  { %2010 = shalt.err (!%p2007_p5)
}
  0x2b   :  { %51 = dma.hbm_to_vmem [thread:$0]  %s2428_s2, 512, %s46_s16, [#allocation9], %s2061_s29, %s2061_s29, %s2062_s30  }
  0x2c   :  { %s2065_s21 = smov [#allocation13]  }
  0x2d   :  { %s71_s22 = sshll.u32 %s2065_s21, 4  ;;  %s72_s22 = int_to_ptr.vmem [resolvable:$true] %s71_s22 }
  0x2e   :  { %s2019_s23 = scalar_lea.vmem %s72_s22, 512  ;;  %p2024_p7 = scmp.lt.s32.totalorder %s72_s22, %s72_s22 }
  0x2f   :  { %p2020_p6 = scmp.ne.s32.totalorder %s72_s22, %s2019_s23  ;;  %p2025_p8 = scmp.lt.s32.totalorder %s2019_s23, %s2019_s23 }
  0x31   :  { %p2026_p9 = por %p2025_p8, %p2024_p7 }
  0x33   :  { %p2027_p10 = pnand %p2026_p9, %p2020_p6 }
  0x35   :  { %2030 = shalt.err (!%p2027_p10)
}
  0x36   :  { %77 = dma.hbm_to_vmem [thread:$0]  %s2431_s5, 512, %s72_s22, [#allocation12], %s2061_s29, %s2061_s29, %s2062_s30  }
  0x37   :  { %2051 = dma.done.wait [#allocation6], 640  }
  0x38   :  { %2052 = vsyncadd [#allocation6], 4294966656 }
  0x39   :  { %2053 = dma.done.wait [#allocation9], 768  }
  0x3a   :  { %2054 = vsyncadd [#allocation9], 4294966528 }
  0x3b   :  { %2055 = dma.done.wait [#allocation12], 1024  }
  0x3c   :  { %2056 = vsyncadd [#allocation12], 4294966272  ;;  %v2066_v0 = vmov 0.0   ;;  %vm2067_vm0 = vmmov 0   ;;  %vm117_vm1 = vcmask 1042432   ;;  %v2149_v2 = vld [vmem:[#allocation8] sm:$0xff] }
  0x3d   :  { %1711 = vmatprep.subr.mxu1 %v2066_v0  ;;  %1715 = vmatprep.mubr.msk.f32.mxu1 %vm2067_vm0, %v2066_v0  ;;  %v2147_v1 = vld [vmem:[#allocation8 + $0x8] sm:$0x7]  ;;  %v106_v3 = vld [vmem:[#allocation5] sm:$0xff]  ;;  %vm113_vm2 = vcmask 89088   ;;  %v193_v4 = vld [vmem:[#allocation5 + $0x8] sm:$0xff]  ;;  %s2068_s25 = smov 32  }
  0x3e   :  { %1725 = vmatprep.subr.mxu0 %v2066_v0  ;;  %1729 = vmatprep.mubr.msk.f32.mxu0 %vm2067_vm0, %v2066_v0  ;;  %v345_v5 = vld [vmem:[#allocation5 + $0x18] sm:$0xff]  ;;  %v2175_v6 = vld [vmem:[#allocation10 + $0x18] sm:$0xff]  ;;  %v2180_v7 = vld [vmem:[#allocation10 + $0x10] sm:$0xff]  ;;  %vm497_vm3 = vcmask 261120   ;;  %vm1593_vm4 = vcmask 195584  }
  0x3f   :  { %1712 = vmatpush3.msk.msra.mxu1 %vm117_vm1, %v2147_v1  ;;  %1726 = vmatpush3.msk.msra.mxu0 %vm117_vm1, %v2147_v1  ;;  %v2186_v8 = vld [vmem:[#allocation10 + $0x8] sm:$0xff]  ;;  %v2190_v9 = vld [vmem:[#allocation10] sm:$0xff]  ;;  %v269_v29 = vld [vmem:[#allocation5 + $0x10] sm:$0xff] }
  0x40   :  { %1713 = vmatprep.subr.mxu1 %v2066_v0  ;;  %1727 = vmatprep.subr.mxu0 %v2066_v0  ;;  %v2214_v16 = vld [vmem:[%s2429_s3] ss:$0 sm:$0xff]  ;;  %v421_v30 = vld [vmem:[#allocation5 + $0x20] sm:$0xff]  ;;  %s2069_s3 = smov 64  }
  0x41   :  { %1714 = vmatpush3.msra.mxu1 %v2149_v2  ;;  %1728 = vmatpush3.msra.mxu0 %v2149_v2 }
  0x42   :  { %1716 = vmatmul.mubr.msk.f32.vlgmr.msra.gmra.mxu1 %vm113_vm2, %v106_v3  ;;  %1718 = vmatprep.subr.mxu1 %v2066_v0 }
  0x43   :  { %1719 = vmatpush3.msk.msra.mxu1 %vm117_vm1, %v2147_v1  ;;  %1722 = vmatprep.mubr.msk.f32.mxu1 %vm2067_vm0, %v2066_v0 }
  0x44   :  { %1720 = vmatprep.subr.mxu1 %v2066_v0  ;;  %1739 = vmatprep.subr.mxu0 %v2066_v0 }
  0x45   :  { %1721 = vmatpush3.msra.mxu1 %v2149_v2  ;;  %1730 = vmatmul.mubr.msk.f32.vlgmr.msra.gmra.mxu0 %vm113_vm2, %v269_v29 }
  0x46   :  { %1723 = vmatmul.mubr.msk.f32.vlgmr.msra.gmra.mxu1 %vm113_vm2, %v193_v4  ;;  %1732 = vmatprep.subr.mxu1 %v2066_v0 }
  0x47   :  { %1733 = vmatpush3.msk.msra.mxu1 %vm117_vm1, %v2147_v1  ;;  %1736 = vmatprep.mubr.msk.f32.mxu1 %vm2067_vm0, %v2066_v0 }
  0x48   :  { %1734 = vmatprep.subr.mxu1 %v2066_v0  ;;  %1740 = vmatpush3.msk.msra.mxu0 %vm117_vm1, %v2147_v1 }
  0x49   :  { %1735 = vmatpush3.msra.mxu1 %v2149_v2  ;;  %1743 = vmatprep.mubr.msk.f32.mxu0 %vm2067_vm0, %v2066_v0 }
  0x4a   :  { %1737 = vmatmul.mubr.msk.f32.vlgmr.msra.gmra.mxu1 %vm113_vm2, %v345_v5  ;;  %1746 = vmatprep.subr.mxu1 %v2066_v0 }
  0x4b   :  { %1747 = vmatpush3.msra.mxu1 %v2175_v6  ;;  %1754 = vmatprep.mubr.msk.f32.mxu1 %vm2067_vm0, %v2066_v0 }
  0x4c   :  { %1748 = vmatprep.subr.mxu1 %v2066_v0  ;;  %1741 = vmatprep.subr.mxu0 %v2066_v0 }
  0x4d   :  { %1749 = vmatpush3.msra.mxu1 %v2180_v7  ;;  %1742 = vmatpush3.msra.mxu0 %v2149_v2 }
  0x4e   :  { %1750 = vmatprep.subr.mxu1 %v2066_v0  ;;  %1744 = vmatmul.mubr.msk.f32.vlgmr.msra.gmra.mxu0 %vm113_vm2, %v421_v30 }
  0x4f   :  { %1751 = vmatpush3.msra.mxu1 %v2186_v8  ;;  %1757 = vmatprep.subr.mxu0 %v2066_v0 }
  0x50   :  { %1752 = vmatprep.subr.mxu1 %v2066_v0  ;;  %1758 = vmatpush3.msra.mxu0 %v2175_v6 }
  0x51   :  { %1753 = vmatpush3.msra.mxu1 %v2190_v9  ;;  %1765 = vmatprep.mubr.msk.f32.mxu0 %vm2067_vm0, %v2066_v0 }
  0x52   :  { %1755 = vmatmul.mubr.f32.vlgmr.msra.gmra.mxu1 %v2066_v0  ;;  %1768 = vmatprep.subr.mxu1 %v2066_v0 }
  0x53   :  { %1769 = vmatpush3.msra.mxu1 %v2175_v6  ;;  %1776 = vmatprep.mubr.msk.f32.mxu1 %vm2067_vm0, %v2066_v0 }
  0x54   :  { %1770 = vmatprep.subr.mxu1 %v2066_v0  ;;  %1759 = vmatprep.subr.mxu0 %v2066_v0 }
  0x55   :  { %1771 = vmatpush3.msra.mxu1 %v2180_v7  ;;  %1760 = vmatpush3.msra.mxu0 %v2180_v7 }
  0x56   :  { %1772 = vmatprep.subr.mxu1 %v2066_v0  ;;  %1761 = vmatprep.subr.mxu0 %v2066_v0 }
  0x57   :  { %1773 = vmatpush3.msra.mxu1 %v2186_v8  ;;  %1762 = vmatpush3.msra.mxu0 %v2186_v8 }
  0x58   :  { %1774 = vmatprep.subr.mxu1 %v2066_v0  ;;  %1763 = vmatprep.subr.mxu0 %v2066_v0 }
  0x59   :  { %1775 = vmatpush3.msra.mxu1 %v2190_v9  ;;  %1764 = vmatpush3.msra.mxu0 %v2190_v9 }
  0x5a   :  { %1790 = vmatprep.subr.mxu1 %v2066_v0  ;;  %1779 = vmatprep.subr.mxu0 %v2066_v0 }
 0x102   :  { %v187_v10 = vpop.f32.mrf.mxu1 }
 0x103   :  { %v188_v17 = vadd.f32 %v2214_v16, %v187_v10  ;;  %v994_v10 = vld [vmem:[#allocation11 + $0x8] sm:$0xff] }
 0x104   :  { %v1717_v11 = vpop.f32.mrf.mxu1 }
 0x105   :  { %v339_v34 = vpop.f32.mrf.mxu0  ;;  %v993_v11 = vld [vmem:[#allocation11] sm:$0xff] }
 0x106   :  { %v2207_v12 = vpop.f32.mrf.mxu1  ;;  %v340_v55 = vadd.f32 %v2214_v16, %v339_v34 }
 0x107   :  { %v1731_v35 = vpop.f32.mrf.mxu0  ;;  %v264_v39 = vadd.f32 %v2214_v16, %v2207_v12 }
 0x108   :  { %v1724_v13 = vpop.f32.mrf.mxu1  ;;  %v2308_v35 = vld [vmem:[#allocation13 + $0x18] sm:$0xff] }
 0x10a   :  { %v2209_v14 = vpop.f32.mrf.mxu1 }
 0x10c   :  { %v1738_v15 = vpop.f32.mrf.mxu1 }
 0x10e   :  { %v2240_v36 = vpop.f32.mrf.mxu0 }
 0x110   :  { %v1745_v37 = vpop.f32.mrf.mxu0 }
 0x111   :  { %v2311_v37 = vld [vmem:[#allocation13 + $0x10] sm:$0xff] }
 0x112   :  { %v567_v18 = vpop.f32.mrf.mxu1 }
 0x113   :  { %v568_v19 = vadd.f32 %v567_v18, %v188_v17  ;;  %v416_v17 = vadd.f32 %v2214_v16, %v2209_v14 }
 0x114   :  { %v1756_v20 = vpop.f32.mrf.mxu1 }
 0x115   :  { %1891 = vtanh.f32 %v568_v19 }
 0x122   :  { %v1892_v21 = vpop.eup %1891 }
 0x123   :  { %576 = vrot.lane.b32.xlu0 %v1892_v21, %s2068_s25  ;;  %v572_v22 = vmul.f32 0.5, %v1892_v21 }
 0x125   :  { %v573_v23 = vadd.f32 0.5, %v572_v22 }
 0x127   :  { %v574_v26 = vmul.f32 0.0, %v573_v23 }
 0x195   :  { %v577_v24 = vpop.permute.xlu0 %576 }
 0x196   :  { %v579_v25 = vmul.f32 %v577_v24, %v573_v23 }
 0x198   :  { %581 = vrot.lane.b32.xlu0 %v579_v25, %s2068_s25 }
 0x20a   :  { %v582_v27 = vpop.permute.xlu0 %581 }
 0x20b   :  { %v584_v28 = vadd.f32 %v582_v27, %v574_v26 }
 0x20d   :  { %1893 = vtanh.f32 %v584_v28 }
 0x21a   :  { %v1894_v31 = vpop.eup %1893 }
 0x21b   :  { %587 = vrot.lane.b32.xlu1 %v1894_v31, %s2068_s25 }
 0x28d   :  { %v588_v32 = vpop.permute.xlu1 %587 }
 0x28e   :  { %v590_v33 = vmul.f32 %v588_v32, %v573_v23 }
 0x290   :  { %592 = vrot.lane.b32.xlu1 %v590_v33, %s2069_s3 }
 0x302   :  { %v593_v38 = vpop.permute.xlu1 %592 }
 0x303   :  { %595 = vst.msk [vmem:[#allocation3] sm:$0xff] %vm497_vm3, %v593_v38  ;;  %1766 = vmatmul.mubr.msk.f32.vlgmr.msra.gmra.mxu0 %vm497_vm3, %v593_v38  ;;  %v2315_v38 = vld [vmem:[#allocation13 + $0x8] sm:$0xff] }
 0x304   :  { %1780 = vmatpush3.msra.mxu0 %v2175_v6  ;;  %1787 = vmatprep.mubr.msk.f32.mxu0 %vm2067_vm0, %v2066_v0 }
 0x305   :  { %1781 = vmatprep.subr.mxu0 %v2066_v0 }
 0x306   :  { %1782 = vmatpush3.msra.mxu0 %v2180_v7 }
 0x307   :  { %1783 = vmatprep.subr.mxu0 %v2066_v0 }
 0x308   :  { %1784 = vmatpush3.msra.mxu0 %v2186_v8 }
 0x309   :  { %1785 = vmatprep.subr.mxu0 %v2066_v0 }
 0x30a   :  { %1786 = vmatpush3.msra.mxu0 %v2190_v9  ;;  %v988_v12 = vld [vmem:[#allocation3] sm:$0xff] }
 0x30b   :  { %1801 = vmatprep.subr.mxu0 %v2066_v0 }
 0x3c3   :  { %v665_v40 = vpop.f32.mrf.mxu0 }
 0x3c4   :  { %v666_v41 = vadd.f32 %v665_v40, %v264_v39  ;;  %v2319_v39 = vld [vmem:[#allocation13] sm:$0xff] }
 0x3c5   :  { %v1767_v42 = vpop.f32.mrf.mxu0 }
 0x3c6   :  { %1895 = vtanh.f32 %v666_v41 }
 0x3d3   :  { %v1896_v43 = vpop.eup %1895 }
 0x3d4   :  { %674 = vrot.lane.b32.xlu0 %v1896_v43, %s2068_s25  ;;  %v670_v44 = vmul.f32 0.5, %v1896_v43 }
 0x3d6   :  { %v671_v45 = vadd.f32 0.5, %v670_v44  ;;  %v492_v44 = vadd.f32 %v2214_v16, %v2240_v36 }
 0x3d8   :  { %v672_v48 = vmul.f32 %v671_v45, %v584_v28 }
 0x446   :  { %v675_v46 = vpop.permute.xlu0 %674 }
 0x447   :  { %v677_v47 = vmul.f32 %v675_v46, %v671_v45 }
 0x449   :  { %679 = vrot.lane.b32.xlu1 %v677_v47, %s2068_s25 }
 0x4bb   :  { %v680_v49 = vpop.permute.xlu1 %679 }
 0x4bc   :  { %v682_v50 = vadd.f32 %v680_v49, %v672_v48  ;;  %v2356_v48 = vld [vmem:[%s2432_s6] ss:$0 sm:$0xff]  ;;  %s2070_s6 = smov [#allocation14]  }
 0x4bd   :  { %s1601_s28 = sshll.u32 %s2070_s6, 4  ;;  %s1602_s28 = int_to_ptr.vmem [resolvable:$true] %s1601_s28 }
 0x4be   :  { %1897 = vtanh.f32 %v682_v50  ;;  %s2031_s29 = scalar_lea.vmem %s1602_s28, 128  ;;  %p2036_p12 = scmp.lt.s32.totalorder %s1602_s28, %s1602_s28 }
 0x4bf   :  { %p2032_p11 = scmp.ne.s32.totalorder %s1602_s28, %s2031_s29  ;;  %p2037_p13 = scmp.lt.s32.totalorder %s2031_s29, %s2031_s29 }
 0x4c1   :  { %p2038_p0 = por %p2037_p13, %p2036_p12 }
 0x4c3   :  { %p2039_p1 = pnand %p2038_p0, %p2032_p11 }
 0x4cb   :  { %v1898_v51 = vpop.eup %1897 }
 0x4cc   :  { %685 = vrot.lane.b32.xlu0 %v1898_v51, %s2068_s25 }
 0x53e   :  { %v686_v52 = vpop.permute.xlu0 %685 }
 0x53f   :  { %v688_v53 = vmul.f32 %v686_v52, %v671_v45 }
 0x541   :  { %690 = vrot.lane.b32.xlu1 %v688_v53, %s2069_s3 }
 0x5b3   :  { %v691_v54 = vpop.permute.xlu1 %690 }
 0x5b4   :  { %693 = vst.msk [vmem:[#allocation3 + $0x8] sm:$0xff] %vm497_vm3, %v691_v54  ;;  %1777 = vmatmul.mubr.msk.f32.vlgmr.msra.gmra.mxu1 %vm497_vm3, %v691_v54 }
 0x5b5   :  { %1791 = vmatpush3.msra.mxu1 %v2175_v6  ;;  %1798 = vmatprep.mubr.msk.f32.mxu1 %vm2067_vm0, %v2066_v0 }
 0x5b6   :  { %1792 = vmatprep.subr.mxu1 %v2066_v0 }
 0x5b7   :  { %1793 = vmatpush3.msra.mxu1 %v2180_v7  ;;  %v996_v7 = vld [vmem:[#allocation11 + $0x18] sm:$0xff] }
 0x5b8   :  { %1794 = vmatprep.subr.mxu1 %v2066_v0 }
 0x5b9   :  { %1795 = vmatpush3.msra.mxu1 %v2186_v8 }
 0x5ba   :  { %1796 = vmatprep.subr.mxu1 %v2066_v0 }
 0x5bb   :  { %1797 = vmatpush3.msra.mxu1 %v2190_v9  ;;  %v995_v9 = vld [vmem:[#allocation11 + $0x10] sm:$0xff]  ;;  %v989_v13 = vld [vmem:[#allocation3 + $0x8] sm:$0xff] }
 0x5bc   :  { %1824 = vmatprep.subr.mxu1 %v2066_v0 }
 0x674   :  { %v763_v56 = vpop.f32.mrf.mxu1 }
 0x675   :  { %v764_v57 = vadd.f32 %v763_v56, %v340_v55 }
 0x676   :  { %v1778_v58 = vpop.f32.mrf.mxu1 }
 0x677   :  { %1899 = vtanh.f32 %v764_v57 }
 0x684   :  { %v1900_v59 = vpop.eup %1899 }
 0x685   :  { %772 = vrot.lane.b32.xlu0 %v1900_v59, %s2068_s25  ;;  %v768_v60 = vmul.f32 0.5, %v1900_v59 }
 0x687   :  { %v769_v61 = vadd.f32 0.5, %v768_v60 }
 0x689   :  { %v770_v1 = vmul.f32 %v769_v61, %v682_v50 }
 0x6f7   :  { %v773_v62 = vpop.permute.xlu0 %772 }
 0x6f8   :  { %v775_v63 = vmul.f32 %v773_v62, %v769_v61 }
 0x6fa   :  { %777 = vrot.lane.b32.xlu1 %v775_v63, %s2068_s25 }
 0x76c   :  { %v778_v2 = vpop.permute.xlu1 %777 }
 0x76d   :  { %v780_v3 = vadd.f32 %v778_v2, %v770_v1 }
 0x76f   :  { %1901 = vtanh.f32 %v780_v3 }
 0x77c   :  { %v1902_v4 = vpop.eup %1901 }
 0x77d   :  { %783 = vrot.lane.b32.xlu0 %v1902_v4, %s2068_s25 }
 0x7ef   :  { %v784_v5 = vpop.permute.xlu0 %783 }
 0x7f0   :  { %v786_v6 = vmul.f32 %v784_v5, %v769_v61 }
 0x7f2   :  { %788 = vrot.lane.b32.xlu1 %v786_v6, %s2069_s3 }
 0x864   :  { %v789_v8 = vpop.permute.xlu1 %788 }
 0x865   :  { %791 = vst.msk [vmem:[#allocation3 + $0x10] sm:$0xff] %vm497_vm3, %v789_v8  ;;  %1788 = vmatmul.mubr.msk.f32.vlgmr.msra.gmra.mxu0 %vm497_vm3, %v789_v8 }
 0x866   :  { %1802 = vmatpush3.msra.mxu0 %v996_v7  ;;  %1809 = vmatprep.mubr.msk.f32.mxu0 %vm2067_vm0, %v2066_v0 }
 0x867   :  { %1803 = vmatprep.subr.mxu0 %v2066_v0 }
 0x868   :  { %1804 = vmatpush3.msra.mxu0 %v995_v9 }
 0x869   :  { %1805 = vmatprep.subr.mxu0 %v2066_v0 }
 0x86a   :  { %1806 = vmatpush3.msra.mxu0 %v994_v10 }
 0x86b   :  { %1807 = vmatprep.subr.mxu0 %v2066_v0 }
 0x86c   :  { %1808 = vmatpush3.msra.mxu0 %v993_v11  ;;  %v990_v15 = vld [vmem:[#allocation3 + $0x10] sm:$0xff] }
 0x86d   :  { %1810 = vmatmul.mubr.msk.f32.vlgmr.msra.gmra.mxu0 %vm497_vm3, %v988_v12  ;;  %1846 = vmatprep.subr.mxu0 %v2066_v0 }
 0x86e   :  { %1812 = vmatprep.mubr.msk.f32.mxu0 %vm2067_vm0, %v2066_v0  ;;  %1847 = vmatpush3.msra.mxu0 %v2308_v35 }
 0x86f   :  { %1848 = vmatprep.subr.mxu0 %v2066_v0 }
 0x870   :  { %1849 = vmatpush3.msra.mxu0 %v2311_v37 }
 0x871   :  { %1813 = vmatmul.mubr.msk.f32.gmra.mxu0 %vm497_vm3, %v989_v13  ;;  %1850 = vmatprep.subr.mxu0 %v2066_v0 }
 0x872   :  { %1815 = vmatprep.mubr.msk.f32.mxu0 %vm2067_vm0, %v2066_v0  ;;  %1851 = vmatpush3.msra.mxu0 %v2315_v38 }
 0x873   :  { %1852 = vmatprep.subr.mxu0 %v2066_v0 }
 0x874   :  { %1853 = vmatpush3.msra.mxu0 %v2319_v39 }
 0x875   :  { %1816 = vmatmul.mubr.msk.f32.gmra.mxu0 %vm497_vm3, %v990_v15  ;;  %1868 = vmatprep.subr.mxu0 %v2066_v0 }
 0x876   :  { %1818 = vmatprep.mubr.msk.f32.mxu0 %vm2067_vm0, %v2066_v0 }
 0x925   :  { %v861_v18 = vpop.f32.mrf.mxu0 }
 0x926   :  { %v862_v19 = vadd.f32 %v861_v18, %v416_v17 }
 0x927   :  { %v1789_v20 = vpop.f32.mrf.mxu0 }
 0x928   :  { %1903 = vtanh.f32 %v862_v19 }
 0x92d   :  { %v2296_v21 = vpop.f32.mrf.mxu0 }
 0x92e   :  { %v1086_v49 = vadd.f32 %v2356_v48, %v2296_v21 }
 0x92f   :  { %v1811_v22 = vpop.f32.mrf.mxu0 }
 0x931   :  { %v2298_v23 = vpop.f32.mrf.mxu0 }
 0x932   :  { %v1091_v13 = vadd.f32 %v2356_v48, %v2298_v23 }
 0x933   :  { %v1814_v24 = vpop.f32.mrf.mxu0 }
 0x935   :  { %v1904_v25 = vpop.eup %1903  ;;  %v2300_v26 = vpop.f32.mrf.mxu0 }
 0x936   :  { %870 = vrot.lane.b32.xlu0 %v1904_v25, %s2068_s25  ;;  %v866_v28 = vmul.f32 0.5, %v1904_v25 }
 0x937   :  { %v1817_v27 = vpop.f32.mrf.mxu0 }
 0x938   :  { %v867_v29 = vadd.f32 0.5, %v866_v28 }
 0x93a   :  { %v868_v31 = vmul.f32 %v867_v29, %v780_v3 }
 0x9a8   :  { %v871_v30 = vpop.permute.xlu0 %870 }
 0x9a9   :  { %v873_v14 = vmul.f32 %v871_v30, %v867_v29 }
 0x9ab   :  { %875 = vrot.lane.b32.xlu1 %v873_v14, %s2068_s25 }
 0xa1d   :  { %v876_v32 = vpop.permute.xlu1 %875 }
 0xa1e   :  { %v2304_v33 = vadd.f32 %v876_v32, %v868_v31 }
 0xa20   :  { %1905 = vtanh.f32 %v2304_v33 }
 0xa2d   :  { %v1906_v34 = vpop.eup %1905 }
 0xa2e   :  { %881 = vrot.lane.b32.xlu0 %v1906_v34, %s2068_s25 }
 0xaa0   :  { %v882_v40 = vpop.permute.xlu0 %881 }
 0xaa1   :  { %v884_v41 = vmul.f32 %v882_v40, %v867_v29  ;;  %v1096_v40 = vadd.f32 %v2356_v48, %v2300_v26 }
 0xaa3   :  { %886 = vrot.lane.b32.xlu1 %v884_v41, %s2069_s3 }
 0xb15   :  { %v887_v42 = vpop.permute.xlu1 %886 }
 0xb16   :  { %889 = vst.msk [vmem:[#allocation3 + $0x18] sm:$0xff] %vm497_vm3, %v887_v42  ;;  %1799 = vmatmul.mubr.msk.f32.vlgmr.msra.gmra.mxu1 %vm497_vm3, %v887_v42 }
 0xb17   :  { %1825 = vmatpush3.msra.mxu1 %v2308_v35  ;;  %1832 = vmatprep.mubr.msk.f32.mxu1 %vm2067_vm0, %v2066_v0 }
 0xb18   :  { %1826 = vmatprep.subr.mxu1 %v2066_v0 }
 0xb19   :  { %1827 = vmatpush3.msra.mxu1 %v2311_v37 }
 0xb1a   :  { %1828 = vmatprep.subr.mxu1 %v2066_v0 }
 0xb1b   :  { %1829 = vmatpush3.msra.mxu1 %v2315_v38 }
 0xb1c   :  { %1830 = vmatprep.subr.mxu1 %v2066_v0 }
 0xb1d   :  { %1831 = vmatpush3.msra.mxu1 %v2319_v39  ;;  %v991_v43 = vld [vmem:[#allocation3 + $0x18] sm:$0xff] }
 0xb1e   :  { %1833 = vmatmul.mubr.f32.vlgmr.msra.gmra.mxu1 %v2066_v0  ;;  %1819 = vmatmul.mubr.msk.f32.gmra.mxu0 %vm497_vm3, %v991_v43 }
 0xb1f   :  { %1835 = vmatprep.subr.mxu1 %v2066_v0  ;;  %1843 = vmatprep.mubr.msk.f32.mxu1 %vm2067_vm0, %v2066_v0 }
 0xb20   :  { %1836 = vmatpush3.msra.mxu1 %v2308_v35  ;;  %1821 = vmatprep.mubr.msk.f32.mxu0 %vm2067_vm0, %v2066_v0 }
 0xb21   :  { %1837 = vmatprep.subr.mxu1 %v2066_v0 }
 0xb22   :  { %1838 = vmatpush3.msra.mxu1 %v2311_v37 }
 0xb23   :  { %1839 = vmatprep.subr.mxu1 %v2066_v0 }
 0xb24   :  { %1840 = vmatpush3.msra.mxu1 %v2315_v38 }
 0xb25   :  { %1841 = vmatprep.subr.mxu1 %v2066_v0 }
 0xb26   :  { %1842 = vmatpush3.msra.mxu1 %v2319_v39 }
 0xb27   :  { %1857 = vmatprep.subr.mxu1 %v2066_v0 }
 0xbd6   :  { %v959_v45 = vpop.f32.mrf.mxu1 }
 0xbd7   :  { %v960_v46 = vadd.f32 %v959_v45, %v492_v44 }
 0xbd8   :  { %v1800_v47 = vpop.f32.mrf.mxu1 }
 0xbde   :  { %v1181_v50 = vpop.f32.mrf.mxu1  ;;  %v2360_v51 = vpop.f32.mrf.mxu0 }
 0xbdf   :  { %v1182_v52 = vadd.f32 %v1181_v50, %v1086_v49 }
 0xbe0   :  { %v1834_v53 = vpop.f32.mrf.mxu1  ;;  %v1820_v54 = vpop.f32.mrf.mxu0 }
 0xbe1   :  { %1907 = vtanh.f32 %v1182_v52  ;;  %v1101_v52 = vadd.f32 %v2356_v48, %v2360_v51 }
 0xbee   :  { %v1908_v55 = vpop.eup %1907 }
 0xbef   :  { %1190 = vrot.lane.b32.xlu0 %v1908_v55, %s2068_s25  ;;  %v1186_v16 = vmul.f32 0.5, %v1908_v55 }
 0xbf1   :  { %v1187_v36 = vadd.f32 0.5, %v1186_v16 }
 0xbf3   :  { %v1188_v58 = vmul.f32 0.0, %v1187_v36 }
 0xc61   :  { %v1191_v56 = vpop.permute.xlu0 %1190 }
 0xc62   :  { %v1193_v57 = vmul.f32 %v1191_v56, %v1187_v36 }
 0xc64   :  { %1195 = vrot.lane.b32.xlu1 %v1193_v57, %s2068_s25 }
 0xcd6   :  { %v1196_v59 = vpop.permute.xlu1 %1195 }
 0xcd7   :  { %v1198_v60 = vadd.f32 %v1196_v59, %v1188_v58 }
 0xcd9   :  { %1909 = vtanh.f32 %v1198_v60 }
 0xcda   :  { %1911 = vtanh.f32 %v960_v46 }
 0xce6   :  { %v1910_v61 = vpop.eup %1909 }
 0xce7   :  { %1201 = vrot.lane.b32.xlu0 %v1910_v61, %s2068_s25  ;;  %v1912_v62 = vpop.eup %1911 }
 0xce8   :  { %v964_v63 = vmul.f32 0.5, %v1912_v62 }
 0xcea   :  { %v965_v3 = vadd.f32 0.5, %v964_v63 }
 0xceb   :  { %968 = vrot.lane.b32.xlu0 %v1912_v62, %s2068_s25 }
 0xcec   :  { %v966_v7 = vmul.f32 %v965_v3, %v2304_v33 }
 0xd59   :  { %v1202_v1 = vpop.permute.xlu0 %1201 }
 0xd5a   :  { %v1204_v2 = vmul.f32 %v1202_v1, %v1187_v36 }
 0xd5c   :  { %1207 = vrot.lane.b32.xlu1 %v1204_v2, %s2069_s3 }
 0xd5d   :  { %v969_v4 = vpop.permute.xlu0 %968 }
 0xd5e   :  { %v971_v5 = vmul.f32 %v969_v4, %v965_v3 }
 0xd60   :  { %973 = vrot.lane.b32.xlu0 %v971_v5, %s2068_s25 }
 0xdce   :  { %v1208_v6 = vpop.permute.xlu1 %1207 }
 0xdcf   :  { %1844 = vmatmul.mubr.msk.f32.vlgmr.msra.gmra.mxu1 %vm497_vm3, %v1208_v6 }
 0xdd0   :  { %1858 = vmatpush3.msra.mxu1 %v2308_v35  ;;  %1865 = vmatprep.mubr.msk.f32.mxu1 %vm2067_vm0, %v2066_v0 }
 0xdd1   :  { %1859 = vmatprep.subr.mxu1 %v2066_v0 }
 0xdd2   :  { %v974_v8 = vpop.permute.xlu0 %973  ;;  %1860 = vmatpush3.msra.mxu1 %v2311_v37 }
 0xdd3   :  { %v976_v9 = vadd.f32 %v974_v8, %v966_v7  ;;  %1861 = vmatprep.subr.mxu1 %v2066_v0 }
 0xdd4   :  { %1862 = vmatpush3.msra.mxu1 %v2315_v38 }
 0xdd5   :  { %1913 = vtanh.f32 %v976_v9  ;;  %1863 = vmatprep.subr.mxu1 %v2066_v0 }
 0xdd6   :  { %1864 = vmatpush3.msra.mxu1 %v2319_v39 }
 0xde2   :  { %v1914_v10 = vpop.eup %1913 }
 0xde3   :  { %979 = vrot.lane.b32.xlu0 %v1914_v10, %s2068_s25 }
 0xe55   :  { %v980_v11 = vpop.permute.xlu0 %979 }
 0xe56   :  { %v982_v12 = vmul.f32 %v980_v11, %v965_v3 }
 0xe58   :  { %984 = vrot.lane.b32.xlu0 %v982_v12, %s2069_s3 }
 0xe8f   :  { %v1277_v15 = vpop.f32.mrf.mxu1 }
 0xe90   :  { %v1278_v17 = vadd.f32 %v1277_v15, %v1091_v13 }
 0xe91   :  { %v1845_v18 = vpop.f32.mrf.mxu1 }
 0xe92   :  { %1915 = vtanh.f32 %v1278_v17 }
 0xe9f   :  { %v1916_v19 = vpop.eup %1915 }
 0xea0   :  { %1286 = vrot.lane.b32.xlu1 %v1916_v19, %s2068_s25  ;;  %v1282_v22 = vmul.f32 0.5, %v1916_v19 }
 0xea2   :  { %v1283_v24 = vadd.f32 0.5, %v1282_v22 }
 0xea4   :  { %v1284_v27 = vmul.f32 %v1283_v24, %v1198_v60 }
 0xeca   :  { %v985_v20 = vpop.permute.xlu0 %984 }
 0xecb   :  { %987 = vst.msk [vmem:[#allocation3 + $0x20] sm:$0xff] %vm497_vm3, %v985_v20 }
 0xed2   :  { %v992_v21 = vld [vmem:[#allocation3 + $0x20] sm:$0xff] }
 0xed3   :  { %1822 = vmatmul.mubr.msk.f32.gmra.mxu0 %vm497_vm3, %v992_v21 }
 0xed4   :  { %1854 = vmatprep.mubr.msk.f32.mxu0 %vm2067_vm0, %v2066_v0 }
 0xf12   :  { %v1287_v25 = vpop.permute.xlu1 %1286 }
 0xf13   :  { %v1289_v23 = vmul.f32 %v1287_v25, %v1283_v24 }
 0xf15   :  { %1291 = vrot.lane.b32.xlu1 %v1289_v23, %s2068_s25 }
 0xf87   :  { %v1292_v28 = vpop.permute.xlu1 %1291 }
 0xf88   :  { %v1294_v29 = vadd.f32 %v1292_v28, %v1284_v27 }
 0xf8a   :  { %1917 = vtanh.f32 %v1294_v29 }
 0xf93   :  { %v2389_v30 = vpop.f32.mrf.mxu0 }
 0xf94   :  { %v1106_v2 = vadd.f32 %v2356_v48, %v2389_v30 }
 0xf95   :  { %v1823_v14 = vpop.f32.mrf.mxu0 }
 0xf97   :  { %v1918_v31 = vpop.eup %1917 }
 0xf98   :  { %1297 = vrot.lane.b32.xlu1 %v1918_v31, %s2068_s25 }
0x100a   :  { %v1298_v32 = vpop.permute.xlu1 %1297 }
0x100b   :  { %v1300_v33 = vmul.f32 %v1298_v32, %v1283_v24 }
0x100d   :  { %1303 = vrot.lane.b32.xlu1 %v1300_v33, %s2069_s3 }
0x107f   :  { %v1304_v34 = vpop.permute.xlu1 %1303 }
0x1080   :  { %1855 = vmatmul.mubr.msk.f32.vlgmr.msra.gmra.mxu0 %vm497_vm3, %v1304_v34 }
0x1081   :  { %1869 = vmatpush3.msra.mxu0 %v2308_v35  ;;  %1876 = vmatprep.mubr.msk.f32.mxu0 %vm2067_vm0, %v2066_v0 }
0x1082   :  { %1870 = vmatprep.subr.mxu0 %v2066_v0 }
0x1083   :  { %1871 = vmatpush3.msra.mxu0 %v2311_v37 }
0x1084   :  { %1872 = vmatprep.subr.mxu0 %v2066_v0 }
0x1085   :  { %1873 = vmatpush3.msra.mxu0 %v2315_v38 }
0x1086   :  { %1874 = vmatprep.subr.mxu0 %v2066_v0 }
0x1087   :  { %1875 = vmatpush3.msra.mxu0 %v2319_v39 }
0x1140   :  { %v1373_v41 = vpop.f32.mrf.mxu0 }
0x1141   :  { %v1374_v35 = vadd.f32 %v1373_v41, %v1096_v40 }
0x1142   :  { %v1856_v42 = vpop.f32.mrf.mxu0 }
0x1143   :  { %1919 = vtanh.f32 %v1374_v35 }
0x1150   :  { %v1920_v43 = vpop.eup %1919 }
0x1151   :  { %1382 = vrot.lane.b32.xlu0 %v1920_v43, %s2068_s25  ;;  %v1378_v44 = vmul.f32 0.5, %v1920_v43 }
0x1153   :  { %v1379_v37 = vadd.f32 0.5, %v1378_v44 }
0x1155   :  { %v1380_v38 = vmul.f32 %v1379_v37, %v1294_v29 }
0x11c3   :  { %v1383_v45 = vpop.permute.xlu0 %1382 }
0x11c4   :  { %v1385_v46 = vmul.f32 %v1383_v45, %v1379_v37 }
0x11c6   :  { %1387 = vrot.lane.b32.xlu1 %v1385_v46, %s2068_s25 }
0x1238   :  { %v1388_v0 = vpop.permute.xlu1 %1387 }
0x1239   :  { %v1390_v47 = vadd.f32 %v1388_v0, %v1380_v38 }
0x123b   :  { %1921 = vtanh.f32 %v1390_v47 }
0x1248   :  { %v1922_v39 = vpop.eup %1921 }
0x1249   :  { %1393 = vrot.lane.b32.xlu0 %v1922_v39, %s2068_s25 }
0x12bb   :  { %v1394_v26 = vpop.permute.xlu0 %1393 }
0x12bc   :  { %v1396_v49 = vmul.f32 %v1394_v26, %v1379_v37 }
0x12be   :  { %1399 = vrot.lane.b32.xlu1 %v1396_v49, %s2069_s3 }
0x1330   :  { %v1400_v50 = vpop.permute.xlu1 %1399 }
0x1331   :  { %1866 = vmatmul.mubr.msk.f32.vlgmr.msra.gmra.mxu1 %vm497_vm3, %v1400_v50 }
0x13f1   :  { %v1469_v53 = vpop.f32.mrf.mxu1 }
0x13f2   :  { %v1470_v54 = vadd.f32 %v1469_v53, %v1101_v52 }
0x13f3   :  { %v1867_v55 = vpop.f32.mrf.mxu1 }
0x13f4   :  { %1923 = vtanh.f32 %v1470_v54 }
0x1401   :  { %v1924_v16 = vpop.eup %1923 }
0x1402   :  { %1478 = vrot.lane.b32.xlu0 %v1924_v16, %s2068_s25  ;;  %v1474_v36 = vmul.f32 0.5, %v1924_v16 }
0x1404   :  { %v1475_v56 = vadd.f32 0.5, %v1474_v36 }
0x1406   :  { %v1476_v59 = vmul.f32 %v1475_v56, %v1390_v47 }
0x1474   :  { %v1479_v57 = vpop.permute.xlu0 %1478 }
0x1475   :  { %v1481_v58 = vmul.f32 %v1479_v57, %v1475_v56 }
0x1477   :  { %1483 = vrot.lane.b32.xlu1 %v1481_v58, %s2068_s25 }
0x14e9   :  { %v1484_v60 = vpop.permute.xlu1 %1483 }
0x14ea   :  { %v1486_v61 = vadd.f32 %v1484_v60, %v1476_v59 }
0x14ec   :  { %1925 = vtanh.f32 %v1486_v61 }
0x14f9   :  { %v1926_v62 = vpop.eup %1925 }
0x14fa   :  { %1489 = vrot.lane.b32.xlu0 %v1926_v62, %s2068_s25 }
0x156c   :  { %v1490_v51 = vpop.permute.xlu0 %1489 }
0x156d   :  { %v1492_v63 = vmul.f32 %v1490_v51, %v1475_v56 }
0x156f   :  { %1495 = vrot.lane.b32.xlu1 %v1492_v63, %s2069_s3 }
0x15e1   :  { %v1496_v1 = vpop.permute.xlu1 %1495 }
0x15e2   :  { %1877 = vmatmul.mubr.msk.f32.vlgmr.msra.gmra.mxu0 %vm497_vm3, %v1496_v1 }
0x16a2   :  { %v1565_v3 = vpop.f32.mrf.mxu0 }
0x16a3   :  { %v1566_v4 = vadd.f32 %v1565_v3, %v1106_v2 }
0x16a4   :  { %v1878_v5 = vpop.f32.mrf.mxu0 }
0x16a5   :  { %1927 = vtanh.f32 %v1566_v4 }
0x16b2   :  { %v1928_v6 = vpop.eup %1927 }
0x16b3   :  { %1574 = vrot.lane.b32.xlu0 %v1928_v6, %s2068_s25  ;;  %v1570_v7 = vmul.f32 0.5, %v1928_v6 }
0x16b5   :  { %v1571_v8 = vadd.f32 0.5, %v1570_v7 }
0x16b7   :  { %v1572_v11 = vmul.f32 %v1571_v8, %v1486_v61 }
0x1725   :  { %v1575_v9 = vpop.permute.xlu0 %1574 }
0x1726   :  { %v1577_v10 = vmul.f32 %v1575_v9, %v1571_v8 }
0x1728   :  { %1579 = vrot.lane.b32.xlu1 %v1577_v10, %s2068_s25 }
0x179a   :  { %v1580_v12 = vpop.permute.xlu1 %1579 }
0x179b   :  { %v1582_v13 = vadd.f32 %v1580_v12, %v1572_v11 }
0x179d   :  { %1929 = vtanh.f32 %v1582_v13 }
0x17aa   :  { %v1930_v15 = vpop.eup %1929 }
0x17ab   :  { %1585 = vrot.lane.b32.xlu0 %v1930_v15, %s2068_s25 }
0x181d   :  { %v1586_v48 = vpop.permute.xlu0 %1585 }
0x181e   :  { %v1588_v17 = vmul.f32 %v1586_v48, %v1571_v8 }
0x1820   :  { %1590 = vrot.lane.b32.xlu1 %v1588_v17, %s2069_s3 }
0x1892   :  { %v1591_v18 = vpop.permute.xlu1 %1590 }
0x1893   :  { %1594 = vst.msk [vmem:[#allocation14] sm:$0xff] %vm1593_vm4, %v1591_v18 }
0x1894   :  { %2042 = shalt.err (!%p2039_p1)
}
0x1895   :  { %1604 = dma.vmem_to_hbm [thread:$0]  %s1602_s28, 128, %s2433_s7, [#allocation7]  }
0x1896   :  { %2057 = dma.done.wait [#allocation7], 128  }
0x1897   :  { %2058 = vsyncadd [#allocation7], 4294967168 }
0x1898   :  { %1608 = vsyncpa [#allocation6], 1 }
0x1899   :  { %1609 = vsyncpa [#allocation9], 1 }
0x189a   :  { %1610 = vsyncpa [#allocation12], 1 }
0x189b   :  { %1611 = vsyncpa [#allocation7], 1 }

</bundles_post_ra>
